<compile_context>
chip_gen: v5e
topology: v5e:2x2
jax: 0.10.0
libtpu: 0.0.40
codegen_flags: <defaults>
</compile_context>

<pallas_src>
import jax
import jax.numpy as jnp
from jax.experimental import pallas as pl
from jax.experimental.pallas import tpu as pltpu


def _pupil_kernel(w_ref, z_ref, out_ref):
    """One (TILE_M, L) spatial tile.

    w_ref:   (K,)            f32 SMEM  -- tanh(phase_coeff), scalar-prefetched
    z_ref:   (K, TILE_M, L)  f32 VMEM  -- Zernike basis tile; z_ref[0] = amplitude
    out_ref: (2, TILE_M, L)  f32 VMEM  -- out[0] = Re(pupil), out[1] = Im(pupil)
    """
    K = z_ref.shape[0]
    ampli = z_ref[0]                     # amplitude plane (also mode 0 of the phase)
    # Unrolled VPU FMA chain over K modes (SMEM scalar * vector broadcast).
    # TODO(synk): if a v7x bundle dump shows VALU saturating before DMA, offload
    # this K-mode reduction to the MXU (pad K, pl.dot per strip) per review.
    phase = w_ref[0] * ampli
    for k in range(1, K):
        phase = phase + w_ref[k] * z_ref[k]
    out_ref[0] = ampli * jnp.cos(phase)
    out_ref[1] = ampli * jnp.sin(phase)


def _vmem_budget_bytes() -> int:
    """Generation-aware budget for the double-buffered per-step working set.

    We request vmem_limit_bytes = 32 MiB explicitly, so the budget only needs
    to sit safely below that and below ~1/3 of physical VMEM (64 MiB per core
    on v7x, 128 MiB on v5e/v6e).
    """
    try:
        cap = int(pltpu.get_tpu_info().vmem_capacity_bytes)
    except Exception:
        cap = 64 << 20                    # conservative (v7x-sized) fallback
    return min(24 << 20, max(8 << 20, cap // 3))


def _plan_tiling(K, N, budget_bytes, min_steps=4):
    """Pick the flattened (M, L) spatial layout and rows-per-step tile_m.

    Returns (L, M, tile_m) with:
      * L % 128 == 0                      (lane-dense, unmasked stores)
      * tile_m % 8 == 0 or tile_m == M    ((8, 128) block rule)
      * tile_m divides M
      * 2 * (K + 2) * tile_m * L * 4 <= budget_bytes  (double-buffered set)
      * M // tile_m >= min_steps whenever the array is big enough, so both
        v7x TensorCores get tiles and the DMA pipeline stays busy.
    M * L >= N; when M * L > N the caller zero-pads the flattened input.
    """
    max_tile_elems = max(8 * 128, budget_bytes // (2 * (K + 2) * 4))

    def rows_cap(m_rows, lane):
        cap = max_tile_elems // lane
        if m_rows >= min_steps * 8:
            cap = min(cap, max(8, ((m_rows // min_steps) // 8) * 8))
        return max(8, (cap // 8) * 8)

    # 1) Exact-fit layouts (pure reshape, no copy): largest lane width dividing N.
    for L in (512, 256, 128):
        if N % L:
            continue
        M = N // L
        if M <= 8:
            return L, M, M                          # tiny: one full block
        t = rows_cap(M, L)
        while t >= 8:
            if M % t == 0:
                return L, M, t
            t -= 8
        if M * L <= max_tile_elems:
            return L, M, M                          # small & awkward M: one block
    # 2) Padded layout (rare: N not a multiple of 128 / no usable factorization).
    L = 512 if N >= 8 * 512 else 128
    rows = -(-N // L)
    if rows <= 8:
        return L, rows, rows
    tile_m = rows_cap(rows, L) if rows >= min_steps * 8 else 8
    M = -(-rows // tile_m) * tile_m
    return L, M, tile_m


def pupil_estimate_ca(zernike_pupils: jax.Array, phase_coeff: jax.Array, *,
                      as_complex: bool = True,
                      vmem_budget_bytes: int | None = None):
    """Pallas implementation of PupilEstimate_CA.forward().

    zernike_pupils: (K, H, W) float32
    phase_coeff:    (K, 1, 1) float32 (nn.Parameter shape from the module)
    returns:        (H, W) complex64, or (real, imag) f32 planes if
                    as_complex=False (skips the un-fused combine pass).
    """
    K, H, W = zernike_pupils.shape
    N = H * W
    z = zernike_pupils.astype(jnp.float32)

    # nn.Tanh() on the 15 coefficients: done once here (trivially small); the
    # kernel reads already-activated weights as SMEM scalars every tile.
    w = jnp.tanh(phase_coeff.reshape(K).astype(jnp.float32))

    if vmem_budget_bytes is None:
        vmem_budget_bytes = _vmem_budget_bytes()
    L, M, tile_m = _plan_tiling(K, N, vmem_budget_bytes)
    n_pad = M * L

    zf = z.reshape(K, N)
    if n_pad != N:
        # Rare path: one-off zero-pad of the flattened stack so every block is
        # full-shaped (keeps the pipeline tiled; never falls back to one huge block).
        zf = jnp.pad(zf, ((0, 0), (0, n_pad - N)))
    zf = zf.reshape(K, M, L)

    grid = (M // tile_m,)

    cost = pl.CostEstimate(
        flops=(2 * K + 1) * n_pad,      # K muls + (K-1) adds + 2 amplitude muls
        transcendentals=2 * n_pad,      # cos + sin per element
        bytes_accessed=(K + 2) * n_pad * 4,
    )

    out = pl.pallas_call(
        _pupil_kernel,
        out_shape=jax.ShapeDtypeStruct((2, M, L), jnp.float32),
        grid_spec=pltpu.PrefetchScalarGridSpec(
            num_scalar_prefetch=1,      # tanh(coeff) -> SMEM, passed to index_maps
            grid=grid,
            in_specs=[
                # TODO(synk): add pipeline_mode=pl.Buffered(3) only if a profile
                # shows exposed input DMA at step boundaries (tiny tiles).
                pl.BlockSpec((K, tile_m, L), lambda i, w_ref: (0, i, 0)),
            ],
            out_specs=pl.BlockSpec((2, tile_m, L), lambda i, w_ref: (0, i, 0)),
        ),
        compiler_params=pltpu.CompilerParams(
            # TODO(synk): verify with a trace that this splits the grid across
            # v7x's 2 TensorCores; if not, switch to pltpu.CORE_PARALLEL/core_map.
            dimension_semantics=("parallel",),
            vmem_limit_bytes=32 * 1024 * 1024,   # explicit: above v5e's 16 MiB
                                                 # default, below every gen's physical
        ),
        cost_estimate=cost,
    )(w, zf)

    real, imag = out[0], out[1]
    if n_pad != N:
        real = real.reshape(n_pad)[:N]
        imag = imag.reshape(n_pad)[:N]
    real = real.reshape(H, W)
    imag = imag.reshape(H, W)
    if not as_complex:
        return real, imag                # no extra HBM pass for fused consumers
    # Mosaic emits no complex dtype, so the complex64 view requires one combine
    # pass outside the kernel (unavoidable when a complex result is required).
    return jax.lax.complex(real, imag)


def _reference(zernike_pupils, phase_coeff):
    """Pure-JAX reference mirroring the PyTorch forward."""
    pupil_ampli = zernike_pupils[0, :, :]
    pupil_phase = jnp.sum(zernike_pupils * jnp.tanh(phase_coeff), axis=0)
    return pupil_ampli * jnp.exp(1j * pupil_phase)


if __name__ == "__main__":
    key = jax.random.PRNGKey(0)

    cases = [
        (15, 128, 128),   # exact-fit lane-dense layout: 4 grid steps of (8, 512)
        (15, 64, 64),     # exact-fit, single (8, 512) block
        (15, 20, 24),     # N=480: padded path (zero-pad to one (4, 128) block)
    ]

    for (K, H, W) in cases:
        kz, kc, key = jax.random.split(key, 3)

        # Deterministic synthetic Zernike pupil stack.
        zernike_pupils = jax.random.normal(kz, (K, H, W), dtype=jnp.float32)

        # Module __init__ zero-inits phase_coeff; use small non-zero values so
        # the tanh / complex-exp path is exercised (param shape (15, 1, 1)).
        phase_coeff = 0.1 * jax.random.normal(kc, (K, 1, 1), dtype=jnp.float32)

        pupil = pupil_estimate_ca(zernike_pupils, phase_coeff)
        pupil = jax.block_until_ready(pupil)

        ref = _reference(zernike_pupils, phase_coeff)
        assert pupil.shape == (H, W) and pupil.dtype == jnp.complex64
        err = jnp.max(jnp.abs(pupil - ref))
        assert jnp.allclose(pupil, ref, atol=1e-5, rtol=1e-5), (
            f"mismatch for shape {(K, H, W)}: max |err| = {err}")

    print("KERNEL_OK")
</pallas_src>

<mosaic_0001>
module attributes {stable_mosaic.version = 11 : i64} {
  func.func @_pupil_kernel(%arg0: i32, %arg1: memref<15xf32, #tpu.memory_space<smem>>, %arg2: memref<15x8x512xf32, #tpu.memory_space<vmem>>, %arg3: memref<2x8x512xf32, #tpu.memory_space<vmem>>) attributes {dimension_semantics = [#tpu.dimension_semantics<parallel>], iteration_bounds = array<i64: 4>, scalar_prefetch = 1 : i64, scratch_operands = 0 : i64, tpu.core_type = #tpu.core_type<tc>, window_params = [{transform_indices = @transform_0, window_bounds = array<i64: 15, 8, 512>}, {transform_indices = @transform_1, window_bounds = array<i64: 2, 8, 512>}]} {
    %c0 = arith.constant 0 : index
    %c0_0 = arith.constant 0 : index
    %c0_1 = arith.constant 0 : index
    %0 = vector.load %arg2[%c0, %c0_0, %c0_1] : memref<15x8x512xf32, #tpu.memory_space<vmem>>, vector<1x8x512xf32>
    %1 = vector.shape_cast %0 : vector<1x8x512xf32> to vector<8x512xf32>
    %c0_2 = arith.constant 0 : index
    %2 = memref.load %arg1[%c0_2] : memref<15xf32, #tpu.memory_space<smem>>
    %3 = vector.broadcast %2 : f32 to vector<8x512xf32>
    %4 = arith.mulf %3, %1 : vector<8x512xf32>
    %c1 = arith.constant 1 : index
    %5 = memref.load %arg1[%c1] : memref<15xf32, #tpu.memory_space<smem>>
    %c1_3 = arith.constant 1 : index
    %c0_4 = arith.constant 0 : index
    %c0_5 = arith.constant 0 : index
    %6 = vector.load %arg2[%c1_3, %c0_4, %c0_5] : memref<15x8x512xf32, #tpu.memory_space<vmem>>, vector<1x8x512xf32>
    %7 = vector.shape_cast %6 : vector<1x8x512xf32> to vector<8x512xf32>
    %8 = vector.broadcast %5 : f32 to vector<8x512xf32>
    %9 = arith.mulf %8, %7 : vector<8x512xf32>
    %10 = arith.addf %4, %9 : vector<8x512xf32>
    %c2 = arith.constant 2 : index
    %11 = memref.load %arg1[%c2] : memref<15xf32, #tpu.memory_space<smem>>
    %c2_6 = arith.constant 2 : index
    %c0_7 = arith.constant 0 : index
    %c0_8 = arith.constant 0 : index
    %12 = vector.load %arg2[%c2_6, %c0_7, %c0_8] : memref<15x8x512xf32, #tpu.memory_space<vmem>>, vector<1x8x512xf32>
    %13 = vector.shape_cast %12 : vector<1x8x512xf32> to vector<8x512xf32>
    %14 = vector.broadcast %11 : f32 to vector<8x512xf32>
    %15 = arith.mulf %14, %13 : vector<8x512xf32>
    %16 = arith.addf %10, %15 : vector<8x512xf32>
    %c3 = arith.constant 3 : index
    %17 = memref.load %arg1[%c3] : memref<15xf32, #tpu.memory_space<smem>>
    %c3_9 = arith.constant 3 : index
    %c0_10 = arith.constant 0 : index
    %c0_11 = arith.constant 0 : index
    %18 = vector.load %arg2[%c3_9, %c0_10, %c0_11] : memref<15x8x512xf32, #tpu.memory_space<vmem>>, vector<1x8x512xf32>
    %19 = vector.shape_cast %18 : vector<1x8x512xf32> to vector<8x512xf32>
    %20 = vector.broadcast %17 : f32 to vector<8x512xf32>
    %21 = arith.mulf %20, %19 : vector<8x512xf32>
    %22 = arith.addf %16, %21 : vector<8x512xf32>
    %c4 = arith.constant 4 : index
    %23 = memref.load %arg1[%c4] : memref<15xf32, #tpu.memory_space<smem>>
    %c4_12 = arith.constant 4 : index
    %c0_13 = arith.constant 0 : index
    %c0_14 = arith.constant 0 : index
    %24 = vector.load %arg2[%c4_12, %c0_13, %c0_14] : memref<15x8x512xf32, #tpu.memory_space<vmem>>, vector<1x8x512xf32>
    %25 = vector.shape_cast %24 : vector<1x8x512xf32> to vector<8x512xf32>
    %26 = vector.broadcast %23 : f32 to vector<8x512xf32>
    %27 = arith.mulf %26, %25 : vector<8x512xf32>
    %28 = arith.addf %22, %27 : vector<8x512xf32>
    %c5 = arith.constant 5 : index
    %29 = memref.load %arg1[%c5] : memref<15xf32, #tpu.memory_space<smem>>
    %c5_15 = arith.constant 5 : index
    %c0_16 = arith.constant 0 : index
    %c0_17 = arith.constant 0 : index
    %30 = vector.load %arg2[%c5_15, %c0_16, %c0_17] : memref<15x8x512xf32, #tpu.memory_space<vmem>>, vector<1x8x512xf32>
    %31 = vector.shape_cast %30 : vector<1x8x512xf32> to vector<8x512xf32>
    %32 = vector.broadcast %29 : f32 to vector<8x512xf32>
    %33 = arith.mulf %32, %31 : vector<8x512xf32>
    %34 = arith.addf %28, %33 : vector<8x512xf32>
    %c6 = arith.constant 6 : index
    %35 = memref.load %arg1[%c6] : memref<15xf32, #tpu.memory_space<smem>>
    %c6_18 = arith.constant 6 : index
    %c0_19 = arith.constant 0 : index
    %c0_20 = arith.constant 0 : index
    %36 = vector.load %arg2[%c6_18, %c0_19, %c0_20] : memref<15x8x512xf32, #tpu.memory_space<vmem>>, vector<1x8x512xf32>
    %37 = vector.shape_cast %36 : vector<1x8x512xf32> to vector<8x512xf32>
    %38 = vector.broadcast %35 : f32 to vector<8x512xf32>
    %39 = arith.mulf %38, %37 : vector<8x512xf32>
    %40 = arith.addf %34, %39 : vector<8x512xf32>
    %c7 = arith.constant 7 : index
    %41 = memref.load %arg1[%c7] : memref<15xf32, #tpu.memory_space<smem>>
    %c7_21 = arith.constant 7 : index
    %c0_22 = arith.constant 0 : index
    %c0_23 = arith.constant 0 : index
    %42 = vector.load %arg2[%c7_21, %c0_22, %c0_23] : memref<15x8x512xf32, #tpu.memory_space<vmem>>, vector<1x8x512xf32>
    %43 = vector.shape_cast %42 : vector<1x8x512xf32> to vector<8x512xf32>
    %44 = vector.broadcast %41 : f32 to vector<8x512xf32>
    %45 = arith.mulf %44, %43 : vector<8x512xf32>
    %46 = arith.addf %40, %45 : vector<8x512xf32>
    %c8 = arith.constant 8 : index
    %47 = memref.load %arg1[%c8] : memref<15xf32, #tpu.memory_space<smem>>
    %c8_24 = arith.constant 8 : index
    %c0_25 = arith.constant 0 : index
    %c0_26 = arith.constant 0 : index
    %48 = vector.load %arg2[%c8_24, %c0_25, %c0_26] : memref<15x8x512xf32, #tpu.memory_space<vmem>>, vector<1x8x512xf32>
    %49 = vector.shape_cast %48 : vector<1x8x512xf32> to vector<8x512xf32>
    %50 = vector.broadcast %47 : f32 to vector<8x512xf32>
    %51 = arith.mulf %50, %49 : vector<8x512xf32>
    %52 = arith.addf %46, %51 : vector<8x512xf32>
    %c9 = arith.constant 9 : index
    %53 = memref.load %arg1[%c9] : memref<15xf32, #tpu.memory_space<smem>>
    %c9_27 = arith.constant 9 : index
    %c0_28 = arith.constant 0 : index
    %c0_29 = arith.constant 0 : index
    %54 = vector.load %arg2[%c9_27, %c0_28, %c0_29] : memref<15x8x512xf32, #tpu.memory_space<vmem>>, vector<1x8x512xf32>
    %55 = vector.shape_cast %54 : vector<1x8x512xf32> to vector<8x512xf32>
    %56 = vector.broadcast %53 : f32 to vector<8x512xf32>
    %57 = arith.mulf %56, %55 : vector<8x512xf32>
    %58 = arith.addf %52, %57 : vector<8x512xf32>
    %c10 = arith.constant 10 : index
    %59 = memref.load %arg1[%c10] : memref<15xf32, #tpu.memory_space<smem>>
    %c10_30 = arith.constant 10 : index
    %c0_31 = arith.constant 0 : index
    %c0_32 = arith.constant 0 : index
    %60 = vector.load %arg2[%c10_30, %c0_31, %c0_32] : memref<15x8x512xf32, #tpu.memory_space<vmem>>, vector<1x8x512xf32>
    %61 = vector.shape_cast %60 : vector<1x8x512xf32> to vector<8x512xf32>
    %62 = vector.broadcast %59 : f32 to vector<8x512xf32>
    %63 = arith.mulf %62, %61 : vector<8x512xf32>
    %64 = arith.addf %58, %63 : vector<8x512xf32>
    %c11 = arith.constant 11 : index
    %65 = memref.load %arg1[%c11] : memref<15xf32, #tpu.memory_space<smem>>
    %c11_33 = arith.constant 11 : index
    %c0_34 = arith.constant 0 : index
    %c0_35 = arith.constant 0 : index
    %66 = vector.load %arg2[%c11_33, %c0_34, %c0_35] : memref<15x8x512xf32, #tpu.memory_space<vmem>>, vector<1x8x512xf32>
    %67 = vector.shape_cast %66 : vector<1x8x512xf32> to vector<8x512xf32>
    %68 = vector.broadcast %65 : f32 to vector<8x512xf32>
    %69 = arith.mulf %68, %67 : vector<8x512xf32>
    %70 = arith.addf %64, %69 : vector<8x512xf32>
    %c12 = arith.constant 12 : index
    %71 = memref.load %arg1[%c12] : memref<15xf32, #tpu.memory_space<smem>>
    %c12_36 = arith.constant 12 : index
    %c0_37 = arith.constant 0 : index
    %c0_38 = arith.constant 0 : index
    %72 = vector.load %arg2[%c12_36, %c0_37, %c0_38] : memref<15x8x512xf32, #tpu.memory_space<vmem>>, vector<1x8x512xf32>
    %73 = vector.shape_cast %72 : vector<1x8x512xf32> to vector<8x512xf32>
    %74 = vector.broadcast %71 : f32 to vector<8x512xf32>
    %75 = arith.mulf %74, %73 : vector<8x512xf32>
    %76 = arith.addf %70, %75 : vector<8x512xf32>
    %c13 = arith.constant 13 : index
    %77 = memref.load %arg1[%c13] : memref<15xf32, #tpu.memory_space<smem>>
    %c13_39 = arith.constant 13 : index
    %c0_40 = arith.constant 0 : index
    %c0_41 = arith.constant 0 : index
    %78 = vector.load %arg2[%c13_39, %c0_40, %c0_41] : memref<15x8x512xf32, #tpu.memory_space<vmem>>, vector<1x8x512xf32>
    %79 = vector.shape_cast %78 : vector<1x8x512xf32> to vector<8x512xf32>
    %80 = vector.broadcast %77 : f32 to vector<8x512xf32>
    %81 = arith.mulf %80, %79 : vector<8x512xf32>
    %82 = arith.addf %76, %81 : vector<8x512xf32>
    %c14 = arith.constant 14 : index
    %83 = memref.load %arg1[%c14] : memref<15xf32, #tpu.memory_space<smem>>
    %c14_42 = arith.constant 14 : index
    %c0_43 = arith.constant 0 : index
    %c0_44 = arith.constant 0 : index
    %84 = vector.load %arg2[%c14_42, %c0_43, %c0_44] : memref<15x8x512xf32, #tpu.memory_space<vmem>>, vector<1x8x512xf32>
    %85 = vector.shape_cast %84 : vector<1x8x512xf32> to vector<8x512xf32>
    %86 = vector.broadcast %83 : f32 to vector<8x512xf32>
    %87 = arith.mulf %86, %85 : vector<8x512xf32>
    %88 = arith.addf %82, %87 : vector<8x512xf32>
    %89 = math.cos %88 : vector<8x512xf32>
    %90 = arith.mulf %1, %89 : vector<8x512xf32>
    %c0_45 = arith.constant 0 : index
    %c0_46 = arith.constant 0 : index
    %c0_47 = arith.constant 0 : index
    %91 = vector.load %arg3[%c0_45, %c0_46, %c0_47] : memref<2x8x512xf32, #tpu.memory_space<vmem>>, vector<1x8x512xf32>
    %92 = vector.shape_cast %91 : vector<1x8x512xf32> to vector<8x512xf32>
    %93 = vector.shape_cast %90 : vector<8x512xf32> to vector<1x8x512xf32>
    tpu.vector_store %arg3[%c0_45, %c0_46, %c0_47], %93 {strides = array<i32>} : memref<2x8x512xf32, #tpu.memory_space<vmem>>, vector<1x8x512xf32>,
    %94 = math.sin %88 : vector<8x512xf32>
    %95 = arith.mulf %1, %94 : vector<8x512xf32>
    %c1_48 = arith.constant 1 : index
    %c0_49 = arith.constant 0 : index
    %c0_50 = arith.constant 0 : index
    %96 = vector.load %arg3[%c1_48, %c0_49, %c0_50] : memref<2x8x512xf32, #tpu.memory_space<vmem>>, vector<1x8x512xf32>
    %97 = vector.shape_cast %96 : vector<1x8x512xf32> to vector<8x512xf32>
    %98 = vector.shape_cast %95 : vector<8x512xf32> to vector<1x8x512xf32>
    tpu.vector_store %arg3[%c1_48, %c0_49, %c0_50], %98 {strides = array<i32>} : memref<2x8x512xf32, #tpu.memory_space<vmem>>, vector<1x8x512xf32>,
    return
  }
  func.func @transform_0(%arg0: i32, %arg1: memref<15xf32, #tpu.memory_space<smem>>) -> (i32, i32, i32) {
    %c0_i32 = arith.constant 0 : i32
    %c0_i32_0 = arith.constant 0 : i32
    %c0_i32_1 = arith.constant 0 : i32
    return %c0_i32, %arg0, %c0_i32_0 : i32, i32, i32
  }
  func.func @transform_1(%arg0: i32, %arg1: memref<15xf32, #tpu.memory_space<smem>>) -> (i32, i32, i32) {
    %c0_i32 = arith.constant 0 : i32
    %c0_i32_0 = arith.constant 0 : i32
    %c0_i32_1 = arith.constant 0 : i32
    return %c0_i32, %arg0, %c0_i32_0 : i32, i32, i32
  }
}

</mosaic_0001>

<bundles_post_ra>
// kernel: tpu_custom_call.1
= control target key start
LH: loop header
LB: loop body
LE: loop exit
PB: predicated region body
PF: predicated region fallthrough
CT: control target
= control target key end

     0   :  { %s1998_s12 = smov [#allocation3]   ;;  %s2859_s0 = inlined_call_operand.hbm [shape: f32[15], index: 0, kind: input, shape index: {}]   ;;  %s2860_s1 = inlined_call_operand.hbm [shape: f32[15,32,512], index: 1, kind: input, shape index: {}]   ;;  %s2861_s2 = inlined_call_operand.hbm [shape: f32[2,32,512], index: 2, kind: output, shape index: {}]  }
   0x1   :  { %s8_s11 = sshll.u32 %s2859_s0, 4  ;;  %s9_s11 = int_to_ptr.hbm [resolvable:$true] %s8_s11 }
   0x2   :  { %11 = dma.hbm_to_smem %s9_s11, 16, %s1998_s12, [#allocation2] }
   0x3   :  { %1972 = dma.done.wait [#allocation2], 16 }
   0x4   :  { %1973 = vsyncadd [#allocation2], 4294967280 }
   0x5   :  { %14 = sfence }
   0x6   :  { %15 = vsyncpa [#allocation5], 0 }
   0x7   :  { %17 = vsyncpa [#allocation5 + $0x1], 0 }
   0x8   :  { %18 = vsyncpa [#allocation6], 0 }
   0x9   :  { %20 = vsyncpa [#allocation6 + $0x1], 0  ;;  %s2030_s13 = smov 0   ;;  %s2032_s14 = smov 0  }
   0xa   :  { %s2034_s15 = smov 0   ;;  %s2036_s16 = smov 0  }
   0xb LB: > { %s2051_s0 = sadd.s32 4294967295, %s1996_s16   ;;  %s1708_s17 = sadd.s32 4294967294, %s1996_s16   ;;  %s1996_s16 = sphi %s2036_s16, %s2875_s16   ;;  %s1992_s15 = sphi %s2034_s15, %s2874_s15   ;;  %s1988_s14 = sphi %s2032_s14, %s2873_s14   ;;  %s1984_s13 = sphi %s2030_s13, %s2872_s13  }
   0xc   : > { %s2055_s18 = sadd.s32 1, %s1996_s16   ;;  %s33_s19 = sadd.s32 1, %s1992_s15 }
   0xd   : > { %s30_s20 = ssub.s32 %s1996_s16, %s2055_s18  ;;  %p40_p0 = scmp.ne.s32.totalorder %s1992_s15, %s1988_s14 }
   0xe   : > { %p31_p1 = scmp.eq.s32.totalorder %s30_s20, 0  ;;  %p41_p2 = scmp.eq.s32.totalorder %s1996_s16, 0 }
   0xf   : > { %p46_p3 = scmp.ne.s32.totalorder %s1988_s14, %s1984_s13  ;;  %p47_p4 = scmp.eq.s32.totalorder %s2051_s0, 0 }
  0x10   : > { %s2067_s21 = scalar_select %p31_p1, %s1992_s15, %s33_s19  }
  0x11   : > { %p42_p5 = por %p41_p2, %p40_p0  ;;  %p2069_p6 = por %p47_p4, %p46_p3 }
  0x12   : > { %p70_p7 = scmp.eq.s32.totalorder %s2051_s0, 3  ;;  %p76_p8 = scmp.eq.s32.totalorder %s1708_s17, 3 }
  0x13   : > { %p1834_p9 = scmp.lt.s32.totalorder %s1996_s16, 4  ;;  %s96_s25 = sand.u32 1, %s1992_s15  }
  0x14   : > { %p2075_p10 = por %p70_p7, %p40_p0  ;;  %p2079_p11 = por %p76_p8, %p46_p3 }
  0x15   : > { %s1818_s26 = sshll.u32 %s1996_s16, 5  ;;  %s1820_s27 = smul.u32 480, %s96_s25 }
  0x16   : > { %s105_s30 = scalar_lea.hbm %s2860_s1, %s1818_s26  ;;  %p2088_p12 = pnand %p1834_p9, %p42_p5 }
  0x17   : > { %s106_s4 = sshll.u32 %s105_s30, 4  ;;  %s100_s5 = scalar_lea.vmem [#allocation4], %s1820_s27  ;;  %s107_s4 = int_to_ptr.hbm [resolvable:$true] %s106_s4 }
  0x18   : > { %s108_s6 = sshll.u32 %s100_s5, 4  ;;  %p1713_p13 = scmp.ge.s32.totalorder %s1996_s16, 1  ;;  %s109_s6 = int_to_ptr.vmem [resolvable:$true] %s108_s6 }
  0x19   : > { %s97_s7 = scalar_lea.sflag [#allocation5], %s96_s25  ;;  %s1898_s8 = sshra.s32 %s107_s4, 4  ;;  %s1899_s8 = int_to_ptr.hbm [resolvable:$true] %s1898_s8 }
  0x1a   : > { %s1900_s9 = scalar_lea.hbm %s1899_s8, 480  ;;  %p1902_p1 = pneg %p2088_p12 }
  0x1b   : > { %p1901_p0 = scmp.ne.s32.totalorder %s1899_s8, %s1900_s9  ;;  %s1905_s12 = scalar_lea.hbm %s2860_s1, 1920 }
  0x1c   : > { %p1906_p4 = scmp.lt.s32.totalorder %s1899_s8, %s2860_s1  ;;  %p1907_p5 = scmp.lt.s32.totalorder %s1905_s12, %s1900_s9 }
  0x1d   : > { %p1903_p2 = pnand %p1902_p1, %p1901_p0 }
  0x1e   : > { %p1908_p7 = por %p1907_p5, %p1906_p4 }
  0x1f   : > { %p1904_p3 = pneg %p1903_p2 }
  0x21   : > { %p1909_p8 = pnand %p1908_p7, %p1904_p3 }
  0x23   : > { %1912 = shalt.err (!%p1909_p8)
}
  0x24   : > { %s1999_s20 = smov 2048   ;;  %s2000_s25 = smov 512  }
  0x25   : > { %s2001_s26 = smov 32   ;;  %p116_p9 = scmp.lt.s32.totalorder %s1996_s16, 5 }
  0x26   : > { %1829 = dma.hbm_to_vmem [thread:$0]  (!%p2088_p12), %s107_s4, 7680, %s109_s6, %s97_s7, %s1999_s20, %s2000_s25, %s2001_s26  }
  0x27   : > { %p117_p0 = pnand %p1713_p13, %p116_p9 }
  0x28   : > { %s2107_s27 = sand.u32 (!%p117_p0), 1, %s1988_s14  }
  0x29   : > { %120 = sbr.rel (%p117_p0) target bundleno = 277 (0x115), region = 24  ;;  %s123_s29 = scalar_lea.sflag (!%p117_p0), [#allocation5], %s2107_s27 }
  0x2a   : > { %s1821_s28 = smul.u32 (!%p117_p0), 480, %s2107_s27 }
  0x2c   : > { %s2111_s30 = scalar_lea.vmem (!%p117_p0), [#allocation4], %s1821_s28 }
  0x2e   : > { %1975 = dma.done.wait (%p2069_p6), %s123_s29, 7680  }
  0x2f   : > { %1977 = vsyncadd (%p2069_p6), %s123_s29, 4294959616  ;;  %s150_s3 = sld [smem:[#allocation3]]  ;;  %v146_v0 = vld [vmem:[%s2111_s30] sm:$0xff]  ;;  %v147_v1 = vld [vmem:[%s2111_s30 + $0x8] sm:$0xff]  ;;  %s1714_s26 = sshll.u32 %s2107_s27, 6 }
  0x30   : > { %s1715_s4 = sld [smem:[#allocation3 + $0x1]]  ;;  %v148_v2 = vld [vmem:[%s2111_s30 + $0x10] sm:$0xff]  ;;  %v1716_v7 = vld [vmem:[%s2111_s30 + $0x20] sm:$0xff]  ;;  %v1717_v8 = vld [vmem:[%s2111_s30 + $0x28] sm:$0xff]  ;;  %s2795_s28 = scalar_lea.vmem [#allocation7], %s1714_s26 }
  0x31   : > { %s1720_s5 = sld [smem:[#allocation3 + $0x2]]  ;;  %v1718_v10 = vld [vmem:[%s2111_s30 + $0x30] sm:$0xff]  ;;  %v1721_v13 = vld [vmem:[%s2111_s30 + $0x40] sm:$0xff]  ;;  %v1722_v16 = vld [vmem:[%s2111_s30 + $0x48] sm:$0xff]  ;;  %s1819_s29 = sshll.u32 %s2051_s0, 5 }
  0x32   : > { %s1725_s6 = sld [smem:[#allocation3 + $0x3]]  ;;  %v1723_v17 = vld [vmem:[%s2111_s30 + $0x50] sm:$0xff]  ;;  %v1726_v24 = vld [vmem:[%s2111_s30 + $0x60] sm:$0xff]  ;;  %v1727_v25 = vld [vmem:[%s2111_s30 + $0x68] sm:$0xff]  ;;  %s1632_s0 = sshll.u32 %s2795_s28, 4  ;;  %s1633_s0 = int_to_ptr.vmem [resolvable:$true] %s1632_s0 }
  0x33   : > { %s2117_s7 = sld [smem:[#allocation3 + $0x4]]  ;;  %v1728_v26 = vld [vmem:[%s2111_s30 + $0x70] sm:$0xff]  ;;  %v1731_v29 = vld [vmem:[%s2111_s30 + $0x80] sm:$0xff]  ;;  %v1732_v30 = vld [vmem:[%s2111_s30 + $0x88] sm:$0xff] }
  0x34   : > { %s2131_s22 = sld [smem:[#allocation3 + $0x5]]  ;;  %v1733_v35 = vld [vmem:[%s2111_s30 + $0x90] sm:$0xff]  ;;  %v1736_v42 = vld [vmem:[%s2111_s30 + $0xa0] sm:$0xff]  ;;  %v1737_v43 = vld [vmem:[%s2111_s30 + $0xa8] sm:$0xff] }
  0x35   : > { %v2122_v3 = vstv %s150_s3  ;;  %s2139_s8 = sld [smem:[#allocation3 + $0x6]]  ;;  %v1738_v46 = vld [vmem:[%s2111_s30 + $0xb0] sm:$0xff]  ;;  %v1741_v47 = vld [vmem:[%s2111_s30 + $0xc0] sm:$0xff]  ;;  %v1742_v48 = vld [vmem:[%s2111_s30 + $0xc8] sm:$0xff] }
  0x36   : > { %v152_v4 = vmul.f32 %v2122_v3, %v146_v0  ;;  %v153_v5 = vmul.f32 %v2122_v3, %v147_v1  ;;  %v154_v6 = vmul.f32 %v2122_v3, %v148_v2  ;;  %v2129_v9 = vstv %s1715_s4  ;;  %s2155_s9 = sld [smem:[#allocation3 + $0x7]]  ;;  %v149_v49 = vld [vmem:[%s2111_s30 + $0x18] sm:$0xff]  ;;  %v1743_v53 = vld [vmem:[%s2111_s30 + $0xd0] sm:$0xff]  ;;  %v1746_v62 = vld [vmem:[%s2111_s30 + $0xe0] sm:$0xff] }
  0x37   : > { %v163_v11 = vmul.f32 %v1716_v7, %v2129_v9  ;;  %v164_v12 = vmul.f32 %v1717_v8, %v2129_v9  ;;  %v2137_v14 = vstv %s1720_s5  ;;  %v165_v15 = vmul.f32 %v1718_v10, %v2129_v9  ;;  %s2160_s10 = sld [smem:[#allocation3 + $0x8]]  ;;  %v1719_v55 = vld [vmem:[%s2111_s30 + $0x38] sm:$0xff]  ;;  %v1747_v63 = vld [vmem:[%s2111_s30 + $0xe8] sm:$0xff]  ;;  %v1751_v10 = vld [vmem:[%s2111_s30 + $0x100] sm:$0xff]  ;;  %s1631_s5 = scalar_lea.hbm %s2861_s2, %s1819_s29 }
  0x38   : > { %v178_v18 = vmul.f32 %v1721_v13, %v2137_v14  ;;  %v2145_v19 = vstv %s1725_s6  ;;  %v179_v22 = vmul.f32 %v1722_v16, %v2137_v14  ;;  %v180_v23 = vmul.f32 %v1723_v17, %v2137_v14  ;;  %s2181_s11 = sld [smem:[#allocation3 + $0x9]]  ;;  %s1634_s6 = sshll.u32 %s1631_s5, 4  ;;  %s1635_s6 = int_to_ptr.hbm [resolvable:$true] %s1634_s6 }
  0x39   : > { %v167_v20 = vadd.f32 %v163_v11, %v152_v4  ;;  %v168_v21 = vadd.f32 %v164_v12, %v153_v5  ;;  %v169_v27 = vadd.f32 %v165_v15, %v154_v6  ;;  %v193_v28 = vmul.f32 %v1726_v24, %v2145_v19  ;;  %s2186_s12 = sld [smem:[#allocation3 + $0xa]]  ;;  %v1748_v5 = vld [vmem:[%s2111_s30 + $0xf0] sm:$0xff]  ;;  %v1752_v11 = vld [vmem:[%s2111_s30 + $0x108] sm:$0xff] }
  0x3a   : > { %v194_v33 = vmul.f32 %v1727_v25, %v2145_v19  ;;  %v195_v34 = vmul.f32 %v1728_v26, %v2145_v19  ;;  %v2163_v37 = vstv %s2117_s7  ;;  %v2175_v52 = vstv %s2131_s22  ;;  %s2205_s17 = sld [smem:[#allocation3 + $0xb]]  ;;  %v1756_v25 = vld [vmem:[%s2111_s30 + $0x120] sm:$0xff]  ;;  %v1757_v26 = vld [vmem:[%s2111_s30 + $0x128] sm:$0xff]  ;;  %s1620_s7 = scalar_lea.sflag [#allocation6], %s2107_s27 }
  0x3b   : > { %v182_v31 = vadd.f32 %v178_v18, %v167_v20  ;;  %v183_v32 = vadd.f32 %v179_v22, %v168_v21  ;;  %v184_v36 = vadd.f32 %v180_v23, %v169_v27  ;;  %v208_v40 = vmul.f32 %v1731_v29, %v2163_v37  ;;  %s2211_s19 = sld [smem:[#allocation3 + $0xc]]  ;;  %s1942_s22 = sshra.s32 %s1635_s6, 4  ;;  %s1943_s22 = int_to_ptr.hbm [resolvable:$true] %s1942_s22 }
  0x3c   : > { %v209_v41 = vmul.f32 %v1732_v30, %v2163_v37  ;;  %v210_v45 = vmul.f32 %v1733_v35, %v2163_v37  ;;  %v2179_v54 = vstv %s2139_s8  ;;  %v223_v57 = vmul.f32 %v1736_v42, %v2175_v52  ;;  %s2230_s20 = sld [smem:[#allocation3 + $0xd]]  ;;  %s1944_s8 = scalar_lea.hbm %s1943_s22, 64 }
  0x3d   : > { %v197_v38 = vadd.f32 %v193_v28, %v182_v31  ;;  %v198_v39 = vadd.f32 %v194_v33, %v183_v32  ;;  %v199_v44 = vadd.f32 %v195_v34, %v184_v36  ;;  %v224_v58 = vmul.f32 %v1737_v43, %v2175_v52  ;;  %v1758_v31 = vld [vmem:[%s2111_s30 + $0x130] sm:$0xff]  ;;  %v1761_v32 = vld [vmem:[%s2111_s30 + $0x140] sm:$0xff]  ;;  %v1762_v33 = vld [vmem:[%s2111_s30 + $0x148] sm:$0xff]  ;;  %s2235_s25 = sld [smem:[#allocation3 + $0xe]]  ;;  %p1945_p6 = scmp.ne.s32.totalorder %s1943_s22, %s1944_s8 }
  0x3e   : > { %v225_v59 = vmul.f32 %v1738_v46, %v2175_v52  ;;  %v238_v60 = vmul.f32 %v1741_v47, %v2179_v54  ;;  %v239_v61 = vmul.f32 %v1742_v48, %v2179_v54  ;;  %v155_v0 = vmul.f32 %v2122_v3, %v149_v49  ;;  %v1724_v3 = vld [vmem:[%s2111_s30 + $0x58] sm:$0xff]  ;;  %v1766_v46 = vld [vmem:[%s2111_s30 + $0x160] sm:$0xff]  ;;  %v1767_v47 = vld [vmem:[%s2111_s30 + $0x168] sm:$0xff]  ;;  %p1949_p1 = scmp.lt.s32.totalorder %s1943_s22, %s2861_s2 }
  0x3f   : > { %v212_v50 = vadd.f32 %v208_v40, %v197_v38  ;;  %v213_v51 = vadd.f32 %v209_v41, %v198_v39  ;;  %v214_v56 = vadd.f32 %v210_v45, %v199_v44  ;;  %v240_v4 = vmul.f32 %v1743_v53, %v2179_v54  ;;  %v1763_v38 = vld [vmem:[%s2111_s30 + $0x150] sm:$0xff]  ;;  %v1729_v40 = vld [vmem:[%s2111_s30 + $0x78] sm:$0xff]  ;;  %p1946_p12 = pnand %p1945_p6, %p2075_p10 }
  0x40   : > { %v166_v6 = vmul.f32 %v1719_v55, %v2129_v9  ;;  %v2198_v8 = vstv %s2155_s9  ;;  %v2203_v12 = vstv %s2160_s10  ;;  %v1753_v9 = vld [vmem:[%s2111_s30 + $0x110] sm:$0xff]  ;;  %v181_v28 = vmul.f32 %v1724_v3, %v2137_v14  ;;  %v1777_v3 = vld [vmem:[%s2111_s30 + $0x1a8] sm:$0xff] }
  0x41   : > { %v227_v1 = vadd.f32 %v223_v57, %v212_v50  ;;  %v228_v2 = vadd.f32 %v224_v58, %v213_v51  ;;  %v229_v7 = vadd.f32 %v225_v59, %v214_v56  ;;  %v253_v16 = vmul.f32 %v1746_v62, %v2198_v8  ;;  %v1768_v53 = vld [vmem:[%s2111_s30 + $0x170] sm:$0xff]  ;;  %v1771_v58 = vld [vmem:[%s2111_s30 + $0x180] sm:$0xff]  ;;  %v1772_v59 = vld [vmem:[%s2111_s30 + $0x188] sm:$0xff]  ;;  %p1947_p13 = pneg %p1946_p12 }
  0x42   : > { %v254_v17 = vmul.f32 %v1747_v63, %v2198_v8  ;;  %v255_v20 = vmul.f32 %v1748_v5, %v2198_v8  ;;  %v268_v23 = vmul.f32 %v1751_v10, %v2203_v12  ;;  %v269_v24 = vmul.f32 %v1752_v11, %v2203_v12  ;;  %v1776_v11 = vld [vmem:[%s2111_s30 + $0x1a0] sm:$0xff] }
  0x43   : > { %v242_v13 = vadd.f32 %v238_v60, %v227_v1  ;;  %v243_v15 = vadd.f32 %v239_v61, %v228_v2  ;;  %v244_v18 = vadd.f32 %v240_v4, %v229_v7  ;;  %v170_v27 = vadd.f32 %v166_v6, %v155_v0  ;;  %v1773_v1 = vld [vmem:[%s2111_s30 + $0x190] sm:$0xff]  ;;  %v1734_v4 = vld [vmem:[%s2111_s30 + $0x98] sm:$0xff] }
  0x44   : > { %v270_v30 = vmul.f32 %v1753_v9, %v2203_v12  ;;  %v2224_v36 = vstv %s2181_s11  ;;  %v2228_v39 = vstv %s2186_s12  ;;  %v196_v55 = vmul.f32 %v1729_v40, %v2145_v19  ;;  %v1781_v9 = vld [vmem:[%s2111_s30 + $0x1c0] sm:$0xff]  ;;  %s1948_s11 = scalar_lea.hbm %s2861_s2, 256 }
  0x45   : > { %v257_v21 = vadd.f32 %v253_v16, %v242_v13  ;;  %v258_v22 = vadd.f32 %v254_v17, %v243_v15  ;;  %v259_v29 = vadd.f32 %v255_v20, %v244_v18  ;;  %v283_v41 = vmul.f32 %v1756_v25, %v2224_v36  ;;  %v1778_v17 = vld [vmem:[%s2111_s30 + $0x1b0] sm:$0xff]  ;;  %v1782_v18 = vld [vmem:[%s2111_s30 + $0x1c8] sm:$0xff]  ;;  %p1950_p2 = scmp.lt.s32.totalorder %s1948_s11, %s1944_s8 }
  0x46   : > { %v284_v42 = vmul.f32 %v1757_v26, %v2224_v36  ;;  %v285_v43 = vmul.f32 %v1758_v31, %v2224_v36  ;;  %v298_v44 = vmul.f32 %v1761_v32, %v2228_v39  ;;  %v299_v45 = vmul.f32 %v1762_v33, %v2228_v39 }
  0x47   : > { %v272_v34 = vadd.f32 %v268_v23, %v257_v21  ;;  %v273_v35 = vadd.f32 %v269_v24, %v258_v22  ;;  %v274_v14 = vadd.f32 %v270_v30, %v259_v29  ;;  %v185_v48 = vadd.f32 %v181_v28, %v170_v27  ;;  %v1783_v23 = vld [vmem:[%s2111_s30 + $0x1d0] sm:$0xff]  ;;  %v1739_v29 = vld [vmem:[%s2111_s30 + $0xb8] sm:$0xff]  ;;  %p1951_p3 = por %p1950_p2, %p1949_p1 }
  0x48   : > { %v300_v51 = vmul.f32 %v1763_v38, %v2228_v39  ;;  %v2246_v57 = vstv %s2205_s17  ;;  %v2251_v60 = vstv %s2211_s19  ;;  %v2267_v22 = vstv %s2230_s20 }
  0x49   : > { %v287_v49 = vadd.f32 %v283_v41, %v272_v34  ;;  %v288_v50 = vadd.f32 %v284_v42, %v273_v35  ;;  %v289_v56 = vadd.f32 %v285_v43, %v274_v14  ;;  %v313_v63 = vmul.f32 %v1766_v46, %v2246_v57  ;;  %v1744_v42 = vld [vmem:[%s2111_s30 + $0xd8] sm:$0xff]  ;;  %p1952_p4 = pnand %p1951_p3, %p1947_p13 }
  0x4a   : > { %v314_v0 = vmul.f32 %v1767_v47, %v2246_v57  ;;  %v315_v2 = vmul.f32 %v1768_v53, %v2246_v57  ;;  %v328_v7 = vmul.f32 %v1771_v58, %v2251_v60  ;;  %v329_v10 = vmul.f32 %v1772_v59, %v2251_v60  ;;  %v1749_v58 = vld [vmem:[%s2111_s30 + $0xf8] sm:$0xff] }
  0x4b   : > { %v302_v61 = vadd.f32 %v298_v44, %v287_v49  ;;  %v303_v62 = vadd.f32 %v299_v45, %v288_v50  ;;  %v304_v19 = vadd.f32 %v300_v51, %v289_v56  ;;  %v200_v13 = vadd.f32 %v196_v55, %v185_v48 }
  0x4c   : > { %v330_v16 = vmul.f32 %v1773_v1, %v2251_v60  ;;  %v2271_v24 = vstv %s2235_s25  ;;  %v211_v25 = vmul.f32 %v1734_v4, %v2163_v37  ;;  %v343_v27 = vmul.f32 %v1776_v11, %v2267_v22 }
  0x4d   : > { %v317_v5 = vadd.f32 %v313_v63, %v302_v61  ;;  %v318_v6 = vadd.f32 %v314_v0, %v303_v62  ;;  %v319_v15 = vadd.f32 %v315_v2, %v304_v19  ;;  %v344_v28 = vmul.f32 %v1777_v3, %v2267_v22 }
  0x4e   : > { %v345_v30 = vmul.f32 %v1778_v17, %v2267_v22  ;;  %v358_v31 = vmul.f32 %v1781_v9, %v2271_v24  ;;  %v359_v32 = vmul.f32 %v1782_v18, %v2271_v24  ;;  %v360_v35 = vmul.f32 %v1783_v23, %v2271_v24 }
  0x4f   : > { %v332_v20 = vadd.f32 %v328_v7, %v317_v5  ;;  %v333_v21 = vadd.f32 %v329_v10, %v318_v6  ;;  %v334_v26 = vadd.f32 %v330_v16, %v319_v15  ;;  %v215_v40 = vadd.f32 %v211_v25, %v200_v13 }
  0x50   : > { %v226_v37 = vmul.f32 %v1739_v29, %v2175_v52  ;;  %v241_v52 = vmul.f32 %v1744_v42, %v2179_v54  ;;  %v2303_v54 = vmul.f32 %v1749_v58, %v2198_v8  ;;  %v2002_v15 = vmov 683565275  }
  0x51   : > { %v347_v33 = vadd.f32 %v343_v27, %v332_v20  ;;  %v348_v34 = vadd.f32 %v344_v28, %v333_v21  ;;  %v349_v38 = vadd.f32 %v345_v30, %v334_v26  ;;  %v2003_v8 = vmov 2475754826  }
  0x52   : > { %v230_v49 = vadd.f32 %v226_v37, %v215_v40  ;;  %v2004_v9 = vmov 2131351028   ;;  %v2005_v20 = vmov 2102212464   ;;  %v2006_v23 = vmov 920167782  }
  0x53   : > { %v2282_v14 = vadd.f32 %v358_v31, %v347_v33  ;;  %v2284_v41 = vadd.f32 %v359_v32, %v348_v34  ;;  %v2287_v43 = vadd.f32 %v360_v35, %v349_v38  ;;  %v2007_v33 = vmov 1326507024  }
  0x54   : > { %v2300_v63 = vadd.f32 %v241_v52, %v230_v49 }
  0x55   : > { %v366_v44 = vand.u32 2147483647, %v2282_v14  ;;  %v369_v45 = vand.u32 2139095040, %v2282_v14  ;;  %v520_v46 = vand.u32 2147483647, %v2284_v41  ;;  %v523_v47 = vand.u32 2139095040, %v2284_v41 }
  0x56   : > { %v677_v48 = vand.u32 2139095040, %v2287_v43 }
  0x57   : > { %v370_v50 = vshrl.u32 %v369_v45, 23  ;;  %v373_v51 = vand.u32 8388607, %v366_v44  ;;  %v524_v53 = vshrl.u32 %v523_v47, 23  ;;  %v527_v55 = vand.u32 8388607, %v520_v46 }
  0x58   : > { %v678_v62 = vshrl.u32 %v677_v48, 23 }
  0x59   : > { %v1785_v56 = vadd.s32 4294967169, %v370_v50  ;;  %v374_v59 = vor.u32 8388608, %v373_v51  ;;  %v1788_v61 = vadd.s32 4294967169, %v524_v53  ;;  %v528_v1 = vor.u32 8388608, %v527_v55 }
  0x5a   : > { %v1791_v5 = vadd.s32 4294967169, %v678_v62 }
  0x5b   : > { %v376_v0 = vadd.s32 1, %v1785_v56  ;;  %v530_v19 = vadd.s32 1, %v1788_v61  ;;  %v2305_v4 = vshll.u32 %v374_v59, 8  ;;  %v2311_v3 = vshll.u32 %v528_v1, 8 }
  0x5c   : > { %v2319_v27 = vadd.s32 1, %v1791_v5 }
  0x5d   : > { %vm377_vm0 = vcmp.gt.s32.totalorder %v376_v0, 0  ;;  %vm531_vm1 = vcmp.gt.s32.totalorder %v530_v19, 0  ;;  %v415_v26 = vand.u32 65535, %v2305_v4  ;;  %v416_v31 = vshrl.u32 %v2305_v4, 16 }
  0x5e   : > { %v378_v2 = vsel %vm377_vm0, %v376_v0, 0  ;;  %v532_v7 = vsel %vm531_vm1, %v530_v19, 0  ;;  %vm685_vm15 = vcmp.gt.s32.totalorder %v2319_v27, 0 }
  0x5f   : > { %v380_v6 = vand.u32 31, %v378_v2  ;;  %v2307_v10 = vshrl.u32 %v378_v2, 5  ;;  %v2309_v11 = vand.u32 31, %v532_v7  ;;  %v2339_v52 = vshrl.u32 %v532_v7, 5 }
  0x61   : > { %v381_v13 = vsub.s32 32, %v380_v6  ;;  %v383_v16 = vshll.u32 %v2002_v15, %v380_v6  ;;  %v386_v17 = vshll.u32 %v2003_v8, %v380_v6  ;;  %v389_v18 = vshll.u32 %v2004_v9, %v380_v6 }
  0x62   : > { %v392_v21 = vshll.u32 %v2005_v20, %v380_v6  ;;  %v395_v25 = vshll.u32 %v2006_v23, %v380_v6  ;;  %vm398_vm2 = vcmp.lt.s32.totalorder %v2307_v10, 1  ;;  %vm401_vm3 = vcmp.lt.s32.totalorder %v2307_v10, 4 }
  0x63   : > { %v384_v28 = vshrl.u32 %v2003_v8, %v381_v13  ;;  %v387_v29 = vshrl.u32 %v2004_v9, %v381_v13  ;;  %v390_v30 = vshrl.u32 %v2005_v20, %v381_v13  ;;  %v393_v32 = vshrl.u32 %v2006_v23, %v381_v13 }
  0x64   : > { %v396_v34 = vshrl.u32 %v2007_v33, %v381_v13  ;;  %v2330_v37 = vsub.s32 32, %v2309_v11  ;;  %v382_v42 = vshrl.u32 %v2002_v15, %v381_v13  ;;  %vm400_vm4 = vcmp.lt.s32.totalorder %v2307_v10, 3 }
  0x65   : > { %v385_v35 = vor.u32 %v384_v28, %v383_v16  ;;  %v388_v38 = vor.u32 %v387_v29, %v386_v17  ;;  %v391_v40 = vor.u32 %v390_v30, %v389_v18  ;;  %v394_v45 = vor.u32 %v393_v32, %v392_v21 }
  0x66   : > { %v397_v47 = vor.u32 %v396_v34, %v395_v25  ;;  %vm399_vm5 = vcmp.lt.s32.totalorder %v2307_v10, 2  ;;  %v537_v53 = vshll.u32 %v2002_v15, %v2309_v11  ;;  %v540_v55 = vshll.u32 %v2003_v8, %v2309_v11 }
  0x67   : > { %v406_v48 = vsel %vm398_vm2, %v385_v35, %v388_v38  ;;  %v410_v49 = vsel %vm398_vm2, %v388_v38, %v391_v40  ;;  %v407_v50 = vsel %vm401_vm3, %v394_v45, 920167782  ;;  %v403_v56 = vsel %vm401_vm3, %v391_v40, 2102212464 }
  0x68   : > { %v411_v51 = vsel %vm401_vm3, %v397_v47, 1326507024  ;;  %v408_v58 = vsel %vm400_vm4, %v391_v40, %v407_v50  ;;  %v538_v61 = vshrl.u32 %v2003_v8, %v2330_v37  ;;  %v402_v62 = vsel %vm398_vm2, %v382_v42, %v385_v35 }
  0x69   : > { %v412_v59 = vsel %vm400_vm4, %v394_v45, %v411_v51  ;;  %v409_v0 = vsel %vm399_vm5, %v406_v48, %v408_v58  ;;  %v541_v19 = vshrl.u32 %v2004_v9, %v2330_v37  ;;  %v404_v13 = vsel %vm400_vm4, %v388_v38, %v403_v56 }
  0x6a   : > { %v413_v1 = vsel %vm399_vm5, %v410_v49, %v412_v59  ;;  %v439_v6 = vand.u32 65535, %v409_v0  ;;  %v440_v7 = vshrl.u32 %v409_v0, 16  ;;  %v2367_v16 = vor.u32 %v538_v61, %v537_v53 }
  0x6b   : > { %v417_v2 = vand.u32 65535, %v413_v1  ;;  %v418_v5 = vshrl.u32 %v413_v1, 16  ;;  %v2369_v17 = vor.u32 %v541_v19, %v540_v55  ;;  %v543_v18 = vshll.u32 %v2004_v9, %v2309_v11 }
  0x6c   : > { %v544_v29 = vshrl.u32 %v2005_v20, %v2330_v37  ;;  %v441_v32 = vmul.u32 %v439_v6, %v415_v26  ;;  %v442_v34 = vmul.u32 %v440_v7, %v415_v26  ;;  %v443_v35 = vmul.u32 %v439_v6, %v416_v31 }
  0x6d   : > { %v419_v21 = vmul.u32 %v417_v2, %v415_v26  ;;  %v420_v25 = vmul.u32 %v418_v5, %v415_v26  ;;  %v421_v28 = vmul.u32 %v417_v2, %v416_v31  ;;  %v422_v30 = vmul.u32 %v418_v5, %v416_v31 }
  0x6e   : > { %v444_v45 = vmul.u32 %v440_v7, %v416_v31  ;;  %v445_v48 = vshll.u32 %v442_v34, 16  ;;  %v446_v49 = vshrl.u32 %v442_v34, 16  ;;  %v447_v50 = vshll.u32 %v443_v35, 16 }
  0x6f   : > { %v423_v40 = vshll.u32 %v420_v25, 16  ;;  %v424_v42 = vshrl.u32 %v420_v25, 16  ;;  %v425_v38 = vshll.u32 %v421_v28, 16  ;;  %v426_v47 = vshrl.u32 %v421_v28, 16 }
  0x70   : > { %v448_v53 = vshrl.u32 %v443_v35, 16  ;;  %v546_v55 = vshll.u32 %v2005_v20, %v2309_v11  ;;  %v2008_v56 = vmov 0   ;;  %vm449_vm7 = vc.u32 %v441_v32, %v445_v48 }
  0x71   : > { %vm427_vm6 = vc.u32 %v419_v21, %v423_v40  ;;  %v429_v51 = vadd.s32 %v423_v40, %v419_v21  ;;  %v451_v26 = vadd.s32 %v445_v48, %v441_v32  ;;  %v547_v59 = vshrl.u32 %v2006_v23, %v2330_v37 }
  0x72   : > { %v428_v58 = vsel %vm427_vm6, 1, %v2008_v56  ;;  %v450_v31 = vsel %vm449_vm7, 1, %v2008_v56  ;;  %v549_v0 = vshll.u32 %v2006_v23, %v2309_v11  ;;  %v545_v2 = vor.u32 %v544_v29, %v543_v18 }
  0x73   : > { %v430_v61 = vadd.s32 %v428_v58, %v422_v30  ;;  %vm431_vm8 = vc.u32 %v429_v51, %v425_v38  ;;  %v452_v19 = vadd.s32 %v450_v31, %v444_v45  ;;  %vm453_vm9 = vc.u32 %v451_v26, %v447_v50  ;;  %v1754_v58 = vld [vmem:[%s2111_s30 + $0x118] sm:$0xff] }
  0x74   : > { %v432_v1 = vsel %vm431_vm8, 1, %v2008_v56  ;;  %v454_v6 = vsel %vm453_vm9, 1, %v2008_v56  ;;  %v548_v7 = vor.u32 %v547_v59, %v546_v55  ;;  %v550_v21 = vshrl.u32 %v2007_v33, %v2330_v37 }
  0x75   : > { %v434_v5 = vadd.s32 %v432_v1, %v430_v61  ;;  %v2387_v25 = vadd.s32 %v451_v26, %v447_v50  ;;  %v456_v28 = vadd.s32 %v454_v6, %v452_v19  ;;  %vm552_vm10 = vcmp.lt.s32.totalorder %v2339_v52, 1 }
  0x76   : > { %vm554_vm11 = vcmp.lt.s32.totalorder %v2339_v52, 3  ;;  %v551_v30 = vor.u32 %v550_v21, %v549_v0  ;;  %vm553_vm12 = vcmp.lt.s32.totalorder %v2339_v52, 2  ;;  %vm555_vm13 = vcmp.lt.s32.totalorder %v2339_v52, 4 }
  0x77   : > { %v435_v11 = vadd.s32 %v434_v5, %v424_v42  ;;  %v405_v18 = vsel %vm399_vm5, %v402_v62, %v404_v13  ;;  %v457_v29 = vadd.s32 %v456_v28, %v446_v49  ;;  %v560_v32 = vsel %vm552_vm10, %v2367_v16, %v2369_v17 }
  0x78   : > { %v561_v34 = vsel %vm555_vm13, %v548_v7, 920167782  ;;  %v564_v10 = vsel %vm552_vm10, %v2369_v17, %v545_v2  ;;  %v569_v62 = vand.u32 65535, %v2311_v3  ;;  %v565_v38 = vsel %vm555_vm13, %v551_v30, 1326507024 }
  0x79   : > { %v2401_v35 = vadd.s32 %v435_v11, %v426_v47  ;;  %v562_v40 = vsel %vm554_vm11, %v545_v2, %v561_v34  ;;  %v458_v13 = vadd.s32 %v457_v29, %v448_v53  ;;  %v570_v45 = vshrl.u32 %v2311_v3, 16 }
  0x7a   : > { %v563_v42 = vsel %vm553_vm12, %v560_v32, %v562_v40  ;;  %v459_v47 = vmul.u32 %v2305_v4, %v405_v18  ;;  %v566_v48 = vsel %vm554_vm11, %v548_v7, %v565_v38  ;;  %v260_v50 = vadd.f32 %v2303_v54, %v2300_v63 }
  0x7b   : > { %vm461_vm14 = vc.u32 %v2401_v35, %v2387_v25  ;;  %v593_v49 = vand.u32 65535, %v563_v42  ;;  %v462_v51 = vadd.s32 1, %v458_v13  ;;  %v567_v53 = vsel %vm553_vm12, %v564_v10, %v566_v48 }
  0x7c   : > { %v594_v55 = vshrl.u32 %v563_v42, 16  ;;  %v536_v26 = vshrl.u32 %v2002_v15, %v2330_v37  ;;  %v571_v4 = vand.u32 65535, %v567_v53  ;;  %v572_v59 = vshrl.u32 %v567_v53, 16 }
  0x7d   : > { %v463_v61 = vsel %vm461_vm14, %v462_v51, %v458_v13  ;;  %v557_v31 = vsel %vm555_vm13, %v545_v2, 2102212464  ;;  %v597_v1 = vmul.u32 %v593_v49, %v570_v45  ;;  %v595_v5 = vmul.u32 %v593_v49, %v569_v62  ;;  %v1759_v13 = vld [vmem:[%s2111_s30 + $0x138] sm:$0xff] }
  0x7e   : > { %v596_v0 = vmul.u32 %v594_v55, %v569_v62  ;;  %v464_v63 = vadd.s32 %v463_v61, %v459_v47  ;;  %v573_v54 = vmul.u32 %v571_v4, %v569_v62  ;;  %v574_v19 = vmul.u32 %v572_v59, %v569_v62 }
  0x7f   : > { %v271_v6 = vmul.f32 %v1754_v58, %v2203_v12  ;;  %v575_v7 = vmul.u32 %v571_v4, %v570_v45  ;;  %v2431_v37 = vsel %vm685_vm15, %v2319_v27, 0  ;;  %v556_v11 = vsel %vm552_vm10, %v536_v26, %v2367_v16  ;;  %v1764_v4 = vld [vmem:[%s2111_s30 + $0x158] sm:$0xff] }
  0x80   : > { %v599_v21 = vshll.u32 %v596_v0, 16  ;;  %v465_v28 = vadd.s32 536870912, %v464_v63  ;;  %v576_v2 = vmul.u32 %v572_v59, %v570_v45  ;;  %v577_v30 = vshll.u32 %v574_v19, 16 }
  0x81   : > { %v558_v18 = vsel %vm554_vm11, %v2369_v17, %v557_v31  ;;  %v579_v29 = vshll.u32 %v575_v7, 16  ;;  %v598_v32 = vmul.u32 %v594_v55, %v570_v45  ;;  %v601_v12 = vshll.u32 %v597_v1, 16 }
  0x82   : > { %v2439_v34 = vshrl.u32 %v465_v28, 30  ;;  %vm581_vm0 = vc.u32 %v573_v54, %v577_v30  ;;  %v583_v27 = vadd.s32 %v577_v30, %v573_v54  ;;  %vm603_vm1 = vc.u32 %v595_v5, %v599_v21 }
  0x83   : > { %v578_v40 = vshrl.u32 %v574_v19, 16  ;;  %v582_v10 = vsel %vm581_vm0, 1, %v2008_v56  ;;  %v604_v62 = vsel %vm603_vm1, 1, %v2008_v56  ;;  %v605_v16 = vadd.s32 %v599_v21, %v595_v5 }
  0x84   : > { %v467_v42 = vshll.u32 %v2439_v34, 30  ;;  %v584_v38 = vadd.s32 %v582_v10, %v576_v2  ;;  %vm585_vm2 = vc.u32 %v583_v27, %v579_v29  ;;  %v600_v17 = vshrl.u32 %v596_v0, 16 }
  0x85   : > { %v586_v45 = vsel %vm585_vm2, 1, %v2008_v56  ;;  %v606_v47 = vadd.s32 %v604_v62, %v598_v32  ;;  %vm607_vm3 = vc.u32 %v605_v16, %v601_v12  ;;  %v688_v48 = vand.u32 31, %v2431_v37  ;;  %v1769_v62 = vld [vmem:[%s2111_s30 + $0x178] sm:$0xff] }
  0x86   : > { %v2447_v49 = vsub.s32 %v464_v63, %v467_v42  ;;  %v580_v51 = vshrl.u32 %v575_v7, 16  ;;  %v588_v53 = vadd.s32 %v586_v45, %v584_v38  ;;  %v608_v55 = vsel %vm607_vm3, 1, %v2008_v56 }
  0x87   : > { %v275_v58 = vadd.f32 %v271_v6, %v260_v50  ;;  %v286_v26 = vmul.f32 %v1759_v13, %v2224_v36  ;;  %v602_v59 = vshrl.u32 %v597_v1, 16  ;;  %v610_v61 = vadd.s32 %v608_v55, %v606_v47 }
  0x88   : > { %vm469_vm4 = vcmp.lt.s32.totalorder %v2447_v49, 0  ;;  %v470_v31 = vsub.s32 0, %v2447_v49  ;;  %v589_v0 = vadd.s32 %v588_v53, %v578_v40  ;;  %v2454_v54 = vadd.s32 %v605_v16, %v601_v12 }
  0x89   : > { %v559_v63 = vsel %vm553_vm12, %v556_v11, %v558_v18  ;;  %v611_v19 = vadd.s32 %v610_v61, %v600_v17  ;;  %v2458_v5 = vsub.s32 32, %v688_v48  ;;  %v301_v50 = vmul.f32 %v1764_v4, %v2228_v39  ;;  %v1774_v61 = vld [vmem:[%s2111_s30 + $0x198] sm:$0xff] }
  0x8a   : > { %v471_v36 = vsel %vm469_vm4, %v470_v31, %v2447_v49  ;;  %v2462_v6 = vadd.s32 %v589_v0, %v580_v51  ;;  %v290_v1 = vadd.f32 %v286_v26, %v275_v58  ;;  %v674_v28 = vand.u32 2147483647, %v2287_v43 }
  0x8b   : > { %v472_v7 = vclz %v471_v36  ;;  %v612_v21 = vadd.s32 %v611_v19, %v602_v59  ;;  %v613_v2 = vmul.u32 %v2311_v3, %v559_v63  ;;  %v691_v52 = vshll.u32 %v2002_v15, %v688_v48 }
  0x8c   : > { %vm615_vm5 = vc.u32 %v2462_v6, %v2454_v54  ;;  %v694_v11 = vshll.u32 %v2003_v8, %v688_v48  ;;  %v692_v30 = vshrl.u32 %v2003_v8, %v2458_v5  ;;  %v700_v18 = vshll.u32 %v2005_v20, %v688_v48 }
  0x8d   : > { %v616_v39 = vadd.s32 1, %v612_v21  ;;  %v701_v29 = vshrl.u32 %v2006_v23, %v2458_v5  ;;  %v1786_v32 = vadd.s32 4294967294, %v472_v7  ;;  %v695_v3 = vshrl.u32 %v2004_v9, %v2458_v5 }
  0x8e   : > { %v697_v12 = vshll.u32 %v2004_v9, %v688_v48  ;;  %v698_v27 = vshrl.u32 %v2005_v20, %v2458_v5  ;;  %v2481_v10 = vshrl.u32 %v2431_v37, 5  ;;  %v681_v13 = vand.u32 8388607, %v674_v28 }
  0x8f   : > { %v617_v40 = vsel %vm615_vm5, %v616_v39, %v612_v21  ;;  %v703_v42 = vshll.u32 %v2006_v23, %v688_v48  ;;  %v704_v38 = vshrl.u32 %v2007_v33, %v2458_v5  ;;  %v305_v17 = vadd.f32 %v301_v50, %v290_v1 }
  0x90   : > { %v618_v16 = vadd.s32 %v617_v40, %v613_v2  ;;  %v2489_v45 = vor.u32 %v692_v30, %v691_v52  ;;  %v702_v47 = vor.u32 %v701_v29, %v700_v18  ;;  %vm1787_vm6 = vcmp.lt.s32.totalorder %v1786_v32, 0 }
  0x91   : > { %v2491_v53 = vor.u32 %v695_v3, %v694_v11  ;;  %v2493_v37 = vor.u32 %v698_v27, %v697_v12  ;;  %v316_v55 = vmul.f32 %v1769_v62, %v2246_v57  ;;  %vm706_vm7 = vcmp.lt.s32.totalorder %v2481_v10, 1  ;;  %v1779_v12 = vld [vmem:[%s2111_s30 + $0x1b8] sm:$0xff] }
  0x92   : > { %v619_v51 = vadd.s32 536870912, %v618_v16  ;;  %vm708_vm8 = vcmp.lt.s32.totalorder %v2481_v10, 3  ;;  %vm709_vm9 = vcmp.lt.s32.totalorder %v2481_v10, 4  ;;  %v682_v58 = vor.u32 8388608, %v681_v13 }
  0x93   : > { %v705_v26 = vor.u32 %v704_v38, %v703_v42  ;;  %v475_v4 = vsel %vm1787_vm6, 0, %v1786_v32  ;;  %v715_v59 = vsel %vm709_vm9, %v702_v47, 920167782  ;;  %vm707_vm10 = vcmp.lt.s32.totalorder %v2481_v10, 2 }
  0x94   : > { %v2499_v48 = vshrl.u32 %v619_v51, 30  ;;  %v714_v57 = vsel %vm706_vm7, %v2489_v45, %v2491_v53  ;;  %v716_v0 = vsel %vm708_vm8, %v2493_v37, %v715_v59  ;;  %v320_v63 = vadd.f32 %v316_v55, %v305_v17 }
  0x95   : > { %v718_v19 = vsel %vm706_vm7, %v2491_v53, %v2493_v37  ;;  %v480_v50 = vsub.s32 4294967266, %v475_v4  ;;  %v719_v1 = vsel %vm709_vm9, %v705_v26, 1326507024  ;;  %v2521_v7 = vshll.u32 %v682_v58, 8 }
  0x96   : > { %v621_v31 = vshll.u32 %v2499_v48, 30  ;;  %v331_v21 = vmul.f32 %v1774_v61, %v2251_v60  ;;  %v460_v2 = vadd.s32 %v2387_v25, %v2401_v35  ;;  %v717_v52 = vsel %vm707_vm10, %v714_v57, %v716_v0  ;;  %v1784_v57 = vld [vmem:[%s2111_s30 + $0x1d8] sm:$0xff] }
  0x97   : > { %v720_v11 = vsel %vm708_vm8, %v702_v47, %v719_v1  ;;  %v723_v18 = vand.u32 65535, %v2521_v7  ;;  %v476_v29 = vsub.s32 32, %v475_v4  ;;  %v724_v60 = vshrl.u32 %v2521_v7, 16 }
  0x98   : > { %v2517_v36 = vsub.s32 %v618_v16, %v621_v31  ;;  %v721_v30 = vsel %vm707_vm10, %v718_v19, %v720_v11  ;;  %v481_v35 = vadd.s32 127, %v480_v50  ;;  %v748_v16 = vshrl.u32 %v717_v52, 16 }
  0x99   : > { %v725_v32 = vand.u32 65535, %v721_v30  ;;  %v726_v25 = vshrl.u32 %v721_v30, 16  ;;  %v335_v13 = vadd.f32 %v331_v21, %v320_v63  ;;  %v477_v38 = vshll.u32 %v2447_v49, %v475_v4 }
  0x9a   : > { %vm623_vm11 = vcmp.lt.s32.totalorder %v2517_v36, 0  ;;  %v624_v39 = vsub.s32 0, %v2517_v36  ;;  %v478_v17 = vshrl.u32 %v460_v2, %v476_v29  ;;  %v346_v55 = vmul.f32 %v1779_v12, %v2267_v22 }
  0x9b   : > { %v727_v40 = vmul.u32 %v725_v32, %v723_v18  ;;  %v728_v62 = vmul.u32 %v726_v25, %v723_v18  ;;  %v2538_v42 = vmul.u32 %v725_v32, %v724_v60  ;;  %v482_v58 = vshll.u32 %v481_v35, 23 }
  0x9c   : > { %v625_v3 = vsel %vm623_vm11, %v624_v39, %v2517_v36  ;;  %v730_v26 = vmul.u32 %v726_v25, %v724_v60  ;;  %v747_v59 = vand.u32 65535, %v717_v52  ;;  %v614_v61 = vadd.s32 %v2454_v54, %v2462_v6 }
  0x9d   : > { %v626_v27 = vclz %v625_v3  ;;  %v731_v51 = vshll.u32 %v728_v62, 16  ;;  %v750_v31 = vmul.u32 %v748_v16, %v723_v18  ;;  %v733_v63 = vshll.u32 %v2538_v42, 16 }
  0x9e   : > { %v479_v19 = vor.u32 %v478_v17, %v477_v38  ;;  %v483_v1 = vor.u32 4788187, %v482_v58  ;;  %v751_v2 = vmul.u32 %v747_v59, %v724_v60  ;;  %v350_v52 = vadd.f32 %v346_v55, %v335_v13 }
  0x9f   : > { %v1789_v47 = vadd.s32 4294967294, %v626_v27  ;;  %vm735_vm13 = vc.u32 %v727_v40, %v731_v51  ;;  %v737_v4 = vadd.s32 %v731_v51, %v727_v40  ;;  %v361_v11 = vmul.f32 %v1784_v57, %v2271_v24 }
  0xa0   : > { %v736_v49 = vsel %vm735_vm13, 1, %v2008_v56  ;;  %v749_v6 = vmul.u32 %v747_v59, %v723_v18  ;;  %v753_v29 = vshll.u32 %v750_v31, 16  ;;  %v486_v32 = vcvt.s32.f32 %v479_v19 }
  0xa1   : > { %vm1790_vm12 = vcmp.lt.s32.totalorder %v1789_v47, 0  ;;  %v738_v21 = vadd.s32 %v736_v49, %v730_v26  ;;  %vm739_vm14 = vc.u32 %v737_v4, %v733_v63  ;;  %v732_v25 = vshrl.u32 %v728_v62, 16 }
  0xa2   : > { %v629_v0 = vsel %vm1790_vm12, 0, %v1789_v47  ;;  %v740_v35 = vsel %vm739_vm14, 1, %v2008_v56  ;;  %v752_v3 = vmul.u32 %v748_v16, %v724_v60  ;;  %v484_v12 = vand.u32 2147483647, %v483_v1 }
  0xa3   : > { %v630_v50 = vsub.s32 32, %v629_v0  ;;  %v634_v22 = vsub.s32 4294967266, %v629_v0  ;;  %v631_v54 = vshll.u32 %v2517_v36, %v629_v0  ;;  %v742_v40 = vadd.s32 %v740_v35, %v738_v21 }
  0xa4   : > { %v755_v38 = vshll.u32 %v751_v2, 16  ;;  %v2550_v17 = vadd.f32 %v361_v11, %v350_v52  ;;  %v690_v24 = vshrl.u32 %v2002_v15, %v2458_v5  ;;  %v711_v36 = vsel %vm709_vm9, %v2493_v37, 2102212464 }
  0xa5   : > { %v632_v39 = vshrl.u32 %v614_v61, %v630_v50  ;;  %v635_v30 = vadd.s32 127, %v634_v22  ;;  %vm757_vm15 = vc.u32 %v749_v6, %v753_v29  ;;  %v759_v47 = vadd.s32 %v753_v29, %v749_v6 }
  0xa6   : > { %v758_v62 = vsel %vm757_vm15, 1, %v2008_v56  ;;  %v734_v60 = vshrl.u32 %v2538_v42, 16  ;;  %v743_v16 = vadd.s32 %v742_v40, %v732_v25  ;;  %v487_v55 = vmul.f32 %v486_v32, %v484_v12 }
  0xa7   : > { %v636_v27 = vshll.u32 %v635_v30, 23  ;;  %v633_v18 = vor.u32 %v632_v39, %v631_v54  ;;  %v760_v51 = vadd.s32 %v758_v62, %v752_v3  ;;  %v754_v58 = vshrl.u32 %v750_v31, 16 }
  0xa8   : > { %vm761_vm0 = vc.u32 %v759_v47, %v755_v38  ;;  %v710_v5 = vsel %vm706_vm7, %v690_v24, %v2489_v45  ;;  %v712_v37 = vsel %vm708_vm8, %v2491_v53, %v711_v36  ;;  %v831_v59 = vand.u32 2139095040, %v2550_v17 }
  0xa9   : > { %v637_v13 = vor.u32 4788187, %v636_v27  ;;  %v762_v26 = vsel %vm761_vm0, 1, %v2008_v56  ;;  %v640_v57 = vcvt.s32.f32 %v633_v18  ;;  %v756_v42 = vshrl.u32 %v751_v2, 16 }
  0xaa   : > { %v764_v0 = vadd.s32 %v762_v26, %v760_v51  ;;  %v2567_v63 = vadd.s32 %v743_v16, %v734_v60  ;;  %v2569_v31 = vadd.s32 %v759_v47, %v755_v38  ;;  %v832_v49 = vshrl.u32 %v831_v59, 23 }
  0xab   : > { %v638_v61 = vand.u32 2147483647, %v637_v13  ;;  %v488_v4 = vxor.u32 2147483648, %v487_v55  ;;  %v713_v45 = vsel %vm707_vm10, %v710_v5, %v712_v37  ;;  %vm368_vm1 = vcmp.lt.s32.totalorder %v2282_v14, 0 }
  0xac   : > { %v765_v19 = vadd.s32 %v764_v0, %v754_v58  ;;  %v1794_v53 = vadd.s32 4294967169, %v832_v49  ;;  %v767_v22 = vmul.u32 %v2521_v7, %v713_v45  ;;  %vm769_vm2 = vc.u32 %v2567_v63, %v2569_v31 }
  0xad   : > { %v641_v50 = vmul.f32 %v640_v57, %v638_v61  ;;  %vm2579_vm3 = vcmp.le.f32.partialorder %v366_v44, 0.7853982  ;;  %v489_v10 = vsel %vm368_vm1, %v488_v4, %v487_v55  ;;  %vm522_vm5 = vcmp.lt.s32.totalorder %v2284_v41, 0 }
  0xae   : > { %v766_v1 = vadd.s32 %v765_v19, %v756_v42  ;;  %v838_v21 = vadd.s32 1, %v1794_v53  ;;  %v2589_v6 = vsel %vm2579_vm3, %v2282_v14, %v489_v10  ;;  %v828_v44 = vand.u32 2147483647, %v2550_v17 }
  0xaf   : > { %v642_v11 = vxor.u32 2147483648, %v641_v50  ;;  %v2594_v25 = vmul.f32 %v2589_v6, %v2589_v6  ;;  %vm2598_vm6 = vcmp.le.f32.partialorder %v520_v46, 0.7853982  ;;  %vm676_vm13 = vcmp.lt.s32.totalorder %v2287_v43, 0 }
  0xb0   : > { %v770_v52 = vadd.s32 1, %v766_v1  ;;  %vm839_vm4 = vcmp.gt.s32.totalorder %v838_v21, 0  ;;  %v835_v27 = vand.u32 8388607, %v828_v44  ;;  %vm2675_vm14 = vcmp.le.f32.partialorder %v674_v28, 0.7853982 }
  0xb1   : > { %v840_v7 = vsel %vm839_vm4, %v838_v21, 0  ;;  %v643_v3 = vsel %vm522_vm5, %v642_v11, %v641_v50  ;;  %v495_v60 = vmul.f32 -0.001358992, %v2594_v25  ;;  %v768_v11 = vadd.s32 %v2569_v31, %v2567_v63 }
  0xb2   : > { %v771_v54 = vsel %vm769_vm2, %v770_v52, %v766_v1  ;;  %v842_v30 = vand.u32 31, %v840_v7  ;;  %v2617_v13 = vsel %vm2598_vm6, %v2284_v41, %v643_v3  ;;  %v2620_v47 = vshrl.u32 %v840_v7, 5 }
  0xb3   : > { %v772_v39 = vadd.s32 %v771_v54, %v767_v22  ;;  %v836_v55 = vor.u32 8388608, %v835_v27  ;;  %v2629_v37 = vmul.f32 %v2617_v13, %v2617_v13  ;;  %v2645_v19 = vadd.f32 0.041655596, %v495_v60 }
  0xb4   : > { %v843_v32 = vsub.s32 32, %v842_v30  ;;  %v845_v40 = vshll.u32 %v2002_v15, %v842_v30  ;;  %v848_v38 = vshll.u32 %v2003_v8, %v842_v30  ;;  %v854_v46 = vshll.u32 %v2005_v20, %v842_v30 }
  0xb5   : > { %v773_v29 = vadd.s32 536870912, %v772_v39  ;;  %v851_v16 = vshll.u32 %v2004_v9, %v842_v30  ;;  %v857_v58 = vshll.u32 %v2006_v23, %v842_v30  ;;  %vm860_vm8 = vcmp.lt.s32.totalorder %v2620_v47, 1 }
  0xb6   : > { %v846_v24 = vshrl.u32 %v2003_v8, %v843_v32  ;;  %v849_v36 = vshrl.u32 %v2004_v9, %v843_v32  ;;  %v855_v18 = vshrl.u32 %v2006_v23, %v843_v32  ;;  %v852_v8 = vshrl.u32 %v2005_v20, %v843_v32 }
  0xb7   : > { %v2604_v12 = vshrl.u32 %v773_v29, 30  ;;  %v858_v5 = vshrl.u32 %v2007_v33, %v843_v32  ;;  %v502_v9 = vmul.f32 -0.00019511016, %v2594_v25  ;;  %vm863_vm9 = vcmp.lt.s32.totalorder %v2620_v47, 4 }
  0xb8   : > { %v847_v26 = vor.u32 %v846_v24, %v845_v40  ;;  %v2631_v59 = vor.u32 %v849_v36, %v848_v38  ;;  %v856_v61 = vor.u32 %v855_v18, %v854_v46  ;;  %v853_v20 = vor.u32 %v852_v8, %v851_v16 }
  0xb9   : > { %v775_v62 = vshll.u32 %v2604_v12, 30  ;;  %v859_v42 = vor.u32 %v858_v5, %v857_v58  ;;  %v490_v23 = vsub.s32 4, %v2439_v34  ;;  %vm862_vm10 = vcmp.lt.s32.totalorder %v2620_v47, 3 }
  0xba   : > { %v2638_v0 = vshll.u32 %v836_v55, 8  ;;  %v656_v49 = vmul.f32 -0.00019511016, %v2629_v37  ;;  %vm861_vm11 = vcmp.lt.s32.totalorder %v2620_v47, 2  ;;  %v868_v45 = vsel %vm860_vm8, %v847_v26, %v2631_v59 }
  0xbb   : > { %v776_v51 = vsub.s32 %v772_v39, %v775_v62  ;;  %v869_v53 = vsel %vm863_vm9, %v856_v61, 920167782  ;;  %v873_v50 = vsel %vm863_vm9, %v859_v42, 1326507024  ;;  %v503_v1 = vadd.f32 0.008332121, %v502_v9 }
  0xbc   : > { %v870_v21 = vsel %vm862_vm10, %v853_v20, %v869_v53  ;;  %v872_v10 = vsel %vm860_vm8, %v2631_v59, %v853_v20  ;;  %v649_v52 = vmul.f32 -0.001358992, %v2629_v37  ;;  %v874_v7 = vsel %vm862_vm10, %v856_v61, %v873_v50 }
  0xbd   : > { %vm777_vm7 = vcmp.lt.s32.totalorder %v776_v51, 0  ;;  %v778_v57 = vsub.s32 0, %v776_v51  ;;  %v871_v54 = vsel %vm861_vm11, %v868_v45, %v870_v21  ;;  %v657_v39 = vadd.f32 0.008332121, %v656_v49 }
  0xbe   : > { %v877_v30 = vand.u32 65535, %v2638_v0  ;;  %v878_v29 = vshrl.u32 %v2638_v0, 16  ;;  %v844_v27 = vshrl.u32 %v2002_v15, %v843_v32  ;;  %v875_v40 = vsel %vm861_vm11, %v872_v10, %v874_v7 }
  0xbf   : > { %v779_v33 = vsel %vm777_vm7, %v778_v57, %v776_v51  ;;  %v902_v38 = vshrl.u32 %v871_v54, 16  ;;  %v901_v36 = vand.u32 65535, %v871_v54  ;;  %v504_v46 = vmul.f32 %v503_v1, %v2594_v25 }
  0xc0   : > { %v780_v4 = vclz %v779_v33  ;;  %v650_v18 = vadd.f32 0.041655596, %v649_v52  ;;  %v879_v62 = vand.u32 65535, %v875_v40  ;;  %v880_v60 = vshrl.u32 %v875_v40, 16 }
  0xc1   : > { %v658_v16 = vmul.f32 %v657_v39, %v2629_v37  ;;  %v904_v58 = vmul.u32 %v902_v38, %v877_v30  ;;  %v864_v15 = vsel %vm860_vm8, %v844_v27, %v847_v26  ;;  %v903_v9 = vmul.u32 %v901_v36, %v877_v30 }
  0xc2   : > { %v1792_v22 = vadd.s32 4294967294, %v780_v4  ;;  %v881_v32 = vmul.u32 %v879_v62, %v877_v30  ;;  %v882_v5 = vmul.u32 %v880_v60, %v877_v30  ;;  %v905_v33 = vmul.u32 %v901_v36, %v878_v29 }
  0xc3   : > { %v865_v49 = vsel %vm863_vm9, %v853_v20, 2102212464  ;;  %v884_v4 = vmul.u32 %v880_v60, %v878_v29  ;;  %v906_v1 = vmul.u32 %v902_v38, %v878_v29  ;;  %v908_v39 = vshrl.u32 %v904_v58, 16 }
  0xc4   : > { %vm1793_vm12 = vcmp.lt.s32.totalorder %v1792_v22, 0  ;;  %v885_v45 = vshll.u32 %v882_v5, 16  ;;  %v886_v21 = vshrl.u32 %v882_v5, 16  ;;  %v909_v10 = vshll.u32 %v905_v33, 16 }
  0xc5   : > { %v783_v3 = vsel %vm1793_vm12, 0, %v1792_v22  ;;  %v907_v22 = vshll.u32 %v904_v58, 16  ;;  %v910_v36 = vshrl.u32 %v905_v33, 16  ;;  %v505_v60 = vadd.f32 -0.16666654, %v504_v46 }
  0xc6   : > { %v784_v63 = vsub.s32 32, %v783_v3  ;;  %v785_v31 = vshll.u32 %v776_v51, %v783_v3  ;;  %v788_v24 = vsub.s32 4294967266, %v783_v3  ;;  %v883_v51 = vmul.u32 %v879_v62, %v878_v29 }
  0xc7   : > { %vm889_vm15 = vc.u32 %v881_v32, %v885_v45  ;;  %v891_v28 = vadd.s32 %v885_v45, %v881_v32  ;;  %vm911_vm0 = vc.u32 %v903_v9, %v907_v22  ;;  %v913_v54 = vadd.s32 %v907_v22, %v903_v9 }
  0xc8   : > { %v786_v8 = vshrl.u32 %v768_v11, %v784_v63  ;;  %v789_v55 = vadd.s32 127, %v788_v24  ;;  %v887_v53 = vshll.u32 %v883_v51, 16  ;;  %v890_v11 = vsel %vm889_vm15, 1, %v2008_v56 }
  0xc9   : > { %v892_v7 = vadd.s32 %v890_v11, %v884_v4  ;;  %v912_v20 = vsel %vm911_vm0, 1, %v2008_v56  ;;  %vm915_vm4 = vc.u32 %v913_v54, %v909_v10  ;;  %v866_v29 = vsel %vm862_vm10, %v2631_v59, %v865_v49 }
  0xca   : > { %v787_v57 = vor.u32 %v786_v8, %v785_v31  ;;  %v790_v42 = vshll.u32 %v789_v55, 23  ;;  %vm893_vm2 = vc.u32 %v891_v28, %v887_v53  ;;  %v914_v27 = vadd.s32 %v912_v20, %v906_v1 }
  0xcb   : > { %v894_v3 = vsel %vm893_vm2, 1, %v2008_v56  ;;  %v888_v40 = vshrl.u32 %v883_v51, 16  ;;  %v916_v63 = vsel %vm915_vm4, 1, %v2008_v56  ;;  %v497_v31 = vmul.f32 %v2645_v19, %v2594_v25 }
  0xcc   : > { %v791_v26 = vor.u32 4788187, %v790_v42  ;;  %v794_v50 = vcvt.s32.f32 %v787_v57  ;;  %v896_v38 = vadd.s32 %v894_v3, %v892_v7  ;;  %v918_v62 = vadd.s32 %v916_v63, %v914_v27 }
  0xcd   : > { %v651_v8 = vmul.f32 %v650_v18, %v2629_v37  ;;  %v2691_v58 = vadd.s32 %v913_v54, %v909_v10  ;;  %v659_v32 = vadd.f32 -0.16666654, %v658_v16  ;;  %v867_v5 = vsel %vm861_vm11, %v864_v15, %v866_v29 }
  0xce   : > { %v792_v52 = vand.u32 2147483647, %v791_v26  ;;  %v897_v55 = vadd.s32 %v896_v38, %v886_v21  ;;  %v919_v56 = vadd.s32 %v918_v62, %v908_v39  ;;  %v491_v19 = vsel %vm368_vm1, %v490_v23, %v2439_v34 }
  0xcf   : > { %v498_v16 = vadd.f32 -0.4999988, %v497_v31  ;;  %v644_v51 = vsub.s32 4, %v2499_v48  ;;  %v506_v47 = vmul.f32 %v505_v60, %v2594_v25  ;;  %v652_v15 = vadd.f32 -0.4999988, %v651_v8 }
  0xd0   : > { %v795_v30 = vmul.f32 %v794_v50, %v792_v52  ;;  %v2705_v18 = vadd.s32 %v897_v55, %v888_v40  ;;  %v920_v42 = vadd.s32 %v919_v56, %v910_v36  ;;  %v921_v9 = vmul.u32 %v2638_v0, %v867_v5 }
  0xd1   : > { %v660_v34 = vmul.f32 %v659_v32, %v2629_v37  ;;  %v2715_v4 = vsel %vm2579_vm3, 0, %v491_v19  ;;  %v798_v45 = vsub.s32 4, %v2604_v12  ;;  %v499_v1 = vmul.f32 %v498_v16, %v2594_v25 }
  0xd2   : > { %v796_v24 = vxor.u32 2147483648, %v795_v30  ;;  %vm923_vm7 = vc.u32 %v2705_v18, %v2691_v58  ;;  %v924_v49 = vadd.s32 1, %v920_v42  ;;  %v507_v0 = vadd.f32 1.0, %v506_v47 }
  0xd3   : > { %v645_v22 = vsel %vm522_vm5, %v644_v51, %v2499_v48  ;;  %v653_v28 = vmul.f32 %v652_v15, %v2629_v37  ;;  %v661_v10 = vadd.f32 1.0, %v660_v34  ;;  %v510_v11 = vand.u32 3, %v2715_v4 }
  0xd4   : > { %v797_v59 = vsel %vm676_vm13, %v796_v24, %v795_v30  ;;  %v925_v50 = vsel %vm923_vm7, %v924_v49, %v920_v42  ;;  %v647_v7 = vsel %vm2598_vm6, 0, %v645_v22  ;;  %v799_v25 = vsel %vm676_vm13, %v798_v45, %v2604_v12 }
  0xd5   : > { %v800_v46 = vsel %vm2675_vm14, %v2287_v43, %v797_v59  ;;  %v926_v21 = vadd.s32 %v925_v50, %v921_v9  ;;  %v2729_v30 = vadd.f32 1.0, %v499_v1  ;;  %v2732_v48 = vmul.f32 %v507_v0, %v2589_v6 }
  0xd6   : > { %v802_v57 = vmul.f32 %v800_v46, %v800_v46  ;;  %v664_v37 = vand.u32 3, %v647_v7  ;;  %v2736_v27 = vadd.f32 1.0, %v653_v28  ;;  %v2739_v29 = vmul.f32 %v661_v10, %v2617_v13 }
  0xd7   : > { %v927_v54 = vadd.s32 536870912, %v926_v21  ;;  %v801_v12 = vsel %vm2675_vm14, 0, %v799_v25  ;;  %vm512_vm1 = vcmp.eq.s32.totalorder %v510_v11, 0  ;;  %v513_v24 = vxor.u32 2147483648, %v2732_v48  ;;  %v1883_v25 = vld [vmem:[%s2111_s30 + $0x8] sm:$0xff] }
  0xd8   : > { %v803_v23 = vmul.f32 -0.001358992, %v802_v57  ;;  %v810_v33 = vmul.f32 -0.00019511016, %v802_v57  ;;  %v818_v31 = vand.u32 3, %v801_v12  ;;  %vm515_vm3 = vcmp.eq.s32.totalorder %v510_v11, 2 }
  0xd9   : > { %v2734_v3 = vshrl.u32 %v927_v54, 30  ;;  %v516_v36 = vxor.u32 2147483648, %v2729_v30  ;;  %vm666_vm5 = vcmp.eq.s32.totalorder %v664_v37, 0  ;;  %v667_v13 = vxor.u32 2147483648, %v2739_v29  ;;  %v1882_v54 = vld [vmem:[%s2111_s30] sm:$0xff] }
  0xda   : > { %v804_v53 = vadd.f32 0.041655596, %v803_v23  ;;  %v811_v26 = vadd.f32 0.008332121, %v810_v33  ;;  %v670_v60 = vxor.u32 2147483648, %v2736_v27  ;;  %vm669_vm6 = vcmp.eq.s32.totalorder %v664_v37, 2 }
  0xdb   : > { %v929_v38 = vshll.u32 %v2734_v3, 30  ;;  %vm820_vm9 = vcmp.eq.s32.totalorder %v818_v31, 0  ;;  %vm823_vm10 = vcmp.eq.s32.totalorder %v818_v31, 2  ;;  %vm511_vm11 = vcmp.lt.s32.totalorder %v510_v11, 2 }
  0xdc   : > { %v805_v52 = vmul.f32 %v804_v53, %v802_v57  ;;  %v812_v2 = vmul.f32 %v811_v26, %v802_v57  ;;  %v514_v59 = vsel %vm512_vm1, %v2729_v30, %v513_v24  ;;  %v517_v5 = vsel %vm515_vm3, %v516_v36, %v2732_v48 }
  0xdd   : > { %v930_v62 = vsub.s32 %v926_v21, %v929_v38  ;;  %vm665_vm12 = vcmp.lt.s32.totalorder %v664_v37, 2  ;;  %v668_v19 = vsel %vm666_vm5, %v2736_v27, %v667_v13  ;;  %vm819_vm13 = vcmp.lt.s32.totalorder %v818_v31, 2 }
  0xde   : > { %v806_v39 = vadd.f32 -0.4999988, %v805_v52  ;;  %v813_v20 = vadd.f32 -0.16666654, %v812_v2  ;;  %vm509_vm14 = vweird.f32 %v2282_v14  ;;  %v518_v42 = vsel %vm511_vm11, %v514_v59, %v517_v5 }
  0xdf   : > { %vm931_vm8 = vcmp.lt.s32.totalorder %v930_v62, 0  ;;  %v932_v55 = vsub.s32 0, %v930_v62  ;;  %vm663_vm15 = vweird.f32 %v2284_v41  ;;  %v1134_v9 = vadd.s32 3, %v2715_v4 }
  0xe0   : > { %v807_v35 = vmul.f32 %v806_v39, %v802_v57  ;;  %v814_v40 = vmul.f32 %v813_v20, %v802_v57  ;;  %v1289_v34 = vadd.s32 3, %v647_v7  ;;  %v1444_v23 = vadd.s32 3, %v801_v12  ;;  %v1884_v20 = vld [vmem:[%s2111_s30 + $0x10] sm:$0xff] }
  0xe1   : > { %v933_v56 = vsel %vm931_vm8, %v932_v55, %v930_v62  ;;  %vm817_vm0 = vweird.f32 %v2287_v43  ;;  %v922_v49 = vadd.s32 %v2691_v58, %v2705_v18  ;;  %v519_v45 = vsel %vm509_vm14, nan, %v518_v42 }
  0xe2   : > { %v2744_v63 = vadd.f32 1.0, %v807_v35  ;;  %v815_v6 = vadd.f32 1.0, %v814_v40  ;;  %v934_v16 = vclz %v933_v56  ;;  %v1135_v26 = vand.u32 3, %v1134_v9 }
  0xe3   : > { %v1290_v50 = vand.u32 3, %v1289_v34  ;;  %v1445_v58 = vand.u32 3, %v1444_v23  ;;  %v982_v7 = vmul.f32 %v1882_v54, %v519_v45  ;;  %vm830_vm11 = vcmp.lt.s32.totalorder %v2550_v17, 0 }
  0xe4   : > { %v2750_v61 = vmul.f32 %v815_v6, %v800_v46  ;;  %v824_v8 = vxor.u32 2147483648, %v2744_v63  ;;  %v671_v46 = vsel %vm669_vm6, %v670_v60, %v2739_v29  ;;  %v1795_v47 = vadd.s32 4294967294, %v934_v16 }
  0xe5   : > { %v672_v15 = vsel %vm665_vm12, %v668_v19, %v671_v46  ;;  %vm1137_vm4 = vcmp.eq.s32.totalorder %v1135_v26, 0  ;;  %vm1140_vm7 = vcmp.eq.s32.totalorder %v1135_v26, 2  ;;  %vm1136_vm1 = vcmp.lt.s32.totalorder %v1135_v26, 2  ;;  %986 = vst [vmem:[%s2795_s28] sm:$0xff] %v982_v7 }
  0xe6   : > { %v821_v32 = vxor.u32 2147483648, %v2750_v61  ;;  %v825_v57 = vsel %vm823_vm10, %v824_v8, %v2750_v61  ;;  %vm1796_vm2 = vcmp.lt.s32.totalorder %v1795_v47, 0  ;;  %v673_v1 = vsel %vm663_vm15, nan, %v672_v15 }
  0xe7   : > { %v937_v53 = vsel %vm1796_vm2, 0, %v1795_v47  ;;  %v1139_v10 = vsel %vm1137_vm4, %v2729_v30, %v513_v24  ;;  %v1142_v52 = vsel %vm1140_vm7, %v516_v36, %v2732_v48  ;;  %vm1291_vm3 = vcmp.lt.s32.totalorder %v1290_v50, 2 }
  0xe8   : > { %v822_v51 = vsel %vm820_vm9, %v2744_v63, %v821_v32  ;;  %v938_v4 = vsub.s32 32, %v937_v53  ;;  %v939_v0 = vshll.u32 %v930_v62, %v937_v53  ;;  %v942_v22 = vsub.s32 4294967266, %v937_v53 }
  0xe9   : > { %v826_v33 = vsel %vm819_vm13, %v822_v51, %v825_v57  ;;  %vm1292_vm5 = vcmp.eq.s32.totalorder %v1290_v50, 0  ;;  %vm1295_vm6 = vcmp.eq.s32.totalorder %v1290_v50, 2  ;;  %v983_v39 = vmul.f32 %v1883_v25, %v673_v1 }
  0xea   : > { %v827_v21 = vsel %vm817_vm0, nan, %v826_v33  ;;  %v940_v18 = vshrl.u32 %v922_v49, %v938_v4  ;;  %v943_v28 = vadd.s32 127, %v942_v22  ;;  %v1143_v35 = vsel %vm1136_vm1, %v1139_v10, %v1142_v52 }
  0xeb   : > { %v984_v37 = vmul.f32 %v1884_v20, %v827_v21  ;;  %v1294_v40 = vsel %vm1292_vm5, %v2736_v27, %v667_v13  ;;  %v1297_v30 = vsel %vm1295_vm6, %v670_v60, %v2739_v29  ;;  %v1144_v38 = vsel %vm509_vm14, nan, %v1143_v35  ;;  %987 = vst [vmem:[%s2795_s28 + $0x8] sm:$0xff] %v983_v39 }
  0xec   : > { %v941_v2 = vor.u32 %v940_v18, %v939_v0  ;;  %v944_v11 = vshll.u32 %v943_v28, 23  ;;  %v1298_v6 = vsel %vm1291_vm3, %v1294_v40, %v1297_v30  ;;  %vm1446_vm8 = vcmp.lt.s32.totalorder %v1445_v58, 2 }
  0xed   : > { %v1299_v31 = vsel %vm663_vm15, nan, %v1298_v6  ;;  %vm1447_vm9 = vcmp.eq.s32.totalorder %v1445_v58, 0  ;;  %vm1450_vm10 = vcmp.eq.s32.totalorder %v1445_v58, 2  ;;  %988 = vst [vmem:[%s2795_s28 + $0x10] sm:$0xff] %v984_v37  ;;  %v1610_v36 = vmul.f32 %v1882_v54, %v1144_v38  ;;  %v1885_v58 = vld [vmem:[%s2111_s30 + $0x18] sm:$0xff] }
  0xee   : > { %v945_v48 = vor.u32 4788187, %v944_v11  ;;  %v948_v12 = vcvt.s32.f32 %v941_v2  ;;  %v1449_v29 = vsel %vm1447_vm9, %v2744_v63, %v821_v32  ;;  %v1452_v14 = vsel %vm1450_vm10, %v824_v8, %v2750_v61 }
  0xef   : > { %v1453_v24 = vsel %vm1446_vm8, %v1449_v29, %v1452_v14  ;;  %v1611_v41 = vmul.f32 %v1883_v25, %v1299_v31  ;;  %v952_v60 = vsub.s32 4, %v2734_v3  ;;  %1809 = vst [vmem:[%s2795_s28 + $0x20] sm:$0xff] %v1610_v36  ;;  %vm829_vm12 = vcmp.le.f32.partialorder %v828_v44, 0.7853982 }
  0xf0   : > { %v946_v27 = vand.u32 2147483647, %v945_v48  ;;  %v1454_v13 = vsel %vm817_vm0, nan, %v1453_v24  ;;  %vm971_vm7 = vweird.f32 %v2550_v17 }
  0xf1   : > { %v1612_v55 = vmul.f32 %v1884_v20, %v1454_v13  ;;  %1810 = vst [vmem:[%s2795_s28 + $0x28] sm:$0xff] %v1611_v41  ;;  %v953_v61 = vsel %vm830_vm11, %v952_v60, %v2734_v3 }
  0xf2   : > { %v949_v62 = vmul.f32 %v948_v12, %v946_v27  ;;  %v955_v43 = vsel %vm829_vm12, 0, %v953_v61 }
  0xf3   : > { %1811 = vst [vmem:[%s2795_s28 + $0x30] sm:$0xff] %v1612_v55  ;;  %v1599_v16 = vadd.s32 3, %v955_v43  ;;  %v972_v47 = vand.u32 3, %v955_v43 }
  0xf4   : > { %v950_v32 = vxor.u32 2147483648, %v949_v62 }
  0xf5   : > { %v1600_v15 = vand.u32 3, %v1599_v16  ;;  %vm977_vm13 = vcmp.eq.s32.totalorder %v972_v47, 2  ;;  %vm973_vm15 = vcmp.lt.s32.totalorder %v972_v47, 2  ;;  %vm974_vm0 = vcmp.eq.s32.totalorder %v972_v47, 0 }
  0xf6   : > { %v951_v63 = vsel %vm830_vm11, %v950_v32, %v949_v62 }
  0xf7   : > { %v954_v8 = vsel %vm829_vm12, %v2550_v17, %v951_v63  ;;  %vm1605_vm14 = vcmp.eq.s32.totalorder %v1600_v15, 2  ;;  %vm1602_vm2 = vcmp.eq.s32.totalorder %v1600_v15, 0  ;;  %vm1601_vm4 = vcmp.lt.s32.totalorder %v1600_v15, 2 }
  0xf8   : > { %v956_v59 = vmul.f32 %v954_v8, %v954_v8 }
  0xfa   : > { %v957_v5 = vmul.f32 -0.001358992, %v956_v59  ;;  %v964_v56 = vmul.f32 -0.00019511016, %v956_v59 }
  0xfc   : > { %v958_v19 = vadd.f32 0.041655596, %v957_v5  ;;  %v965_v46 = vadd.f32 0.008332121, %v964_v56 }
  0xfe   : > { %v959_v51 = vmul.f32 %v958_v19, %v956_v59  ;;  %v966_v57 = vmul.f32 %v965_v46, %v956_v59 }
 0x100   : > { %v960_v42 = vadd.f32 -0.4999988, %v959_v51  ;;  %v967_v44 = vadd.f32 -0.16666654, %v966_v57 }
 0x102   : > { %v961_v9 = vmul.f32 %v960_v42, %v956_v59  ;;  %v968_v34 = vmul.f32 %v967_v44, %v956_v59 }
 0x104   : > { %v962_v23 = vadd.f32 1.0, %v961_v9  ;;  %v969_v3 = vadd.f32 1.0, %v968_v34 }
 0x106   : > { %v970_v33 = vmul.f32 %v969_v3, %v954_v8  ;;  %v978_v49 = vxor.u32 2147483648, %v962_v23 }
 0x108   : > { %v975_v45 = vxor.u32 2147483648, %v970_v33  ;;  %v979_v53 = vsel %vm977_vm13, %v978_v49, %v970_v33  ;;  %v1607_v26 = vsel %vm1605_vm14, %v978_v49, %v970_v33 }
 0x10a   : > { %v976_v50 = vsel %vm974_vm0, %v962_v23, %v975_v45  ;;  %v1604_v1 = vsel %vm1602_vm2, %v962_v23, %v975_v45 }
 0x10b   : > { %v980_v4 = vsel %vm973_vm15, %v976_v50, %v979_v53  ;;  %v1608_v0 = vsel %vm1601_vm4, %v1604_v1, %v1607_v26 }
 0x10c   : > { %v981_v22 = vsel %vm971_vm7, nan, %v980_v4  ;;  %v1609_v21 = vsel %vm971_vm7, nan, %v1608_v0 }
 0x10d   : > { %v985_v18 = vmul.f32 %v1885_v58, %v981_v22  ;;  %v1613_v28 = vmul.f32 %v1885_v58, %v1609_v21 }
 0x10f   : > { %989 = vst [vmem:[%s2795_s28 + $0x18] sm:$0xff] %v985_v18 }
 0x110   : > { %1812 = vst [vmem:[%s2795_s28 + $0x38] sm:$0xff] %v1613_v28 }
 0x111   : > { %1955 = shalt.err (!%p1952_p4)
}
 0x112   : > { %s2009_s27 = smov 512   ;;  %s2010_s30 = smov 2048  }
 0x113   : > { %s2011_s19 = smov 32  }
 0x114   : > { %1824 = dma.vmem_to_hbm [thread:$0]  (%p2075_p10), %s1633_s0, 1024, %s1635_s6, %s1620_s7, %s2009_s27, %s2010_s30, %s2011_s19  }
 0x115 PF: > { %p1835_p5 = scmp.ge.s32.totalorder %s1996_s16, 2  ;;  %s1649_s20 = sand.u32 1, %s1984_s13  }
 0x116   : > { %s1650_s25 = scalar_lea.sflag [#allocation6], %s1649_s20 }
 0x117   : > { %p1831_p7 = pnand %p1835_p5, %p2079_p11 }
 0x119   : > { %p1832_p8 = pneg %p1831_p7 }
 0x11b   : > { %1979 = dma.done.wait (%p1832_p8), %s1650_s25, 1024  }
 0x11c   : > { %1981 = vsyncadd (%p1832_p8), %s1650_s25, 4294966272  ;;  %p23_p9 = scmp.ge.s32.totalorder %s2055_s18, 6   ;;  %s2872_s13 = smov %s1988_s14 }
 0x11d   : > { %s2873_s14 = smov %s1992_s15  ;;  %s2874_s15 = smov %s2067_s21 }
 0x11e   : > { %s2875_s16 = smov %s2055_s18  ;;  %25 = sbr.rel (!%p23_p9) target bundleno = 11 (0xb), region = 84 }
 0x123   :  { %1656 = vsyncpa [#allocation5], 1 }
 0x124   :  { %1658 = vsyncpa [#allocation5 + $0x1], 1 }
 0x125   :  { %1659 = vsyncpa [#allocation6], 1 }
 0x126   :  { %1661 = vsyncpa [#allocation6 + $0x1], 1 }

</bundles_post_ra>
